<compile_context>
chip_gen: v7x
topology: tpu7x:2x2x1
jax: 0.10.0
libtpu: 0.0.40
codegen_flags: <defaults>
</compile_context>

<pallas_src>
import functools

import jax
import jax.numpy as jnp
import numpy as np
from jax import lax
from jax.experimental import pallas as pl
from jax.experimental.pallas import tpu as pltpu

_EPS = 1e-5
_LANE = 128


def _round_up(x, m):
    return (x + m - 1) // m * m


# ------------------------- activation layout helper ------------------------- #

def _phase_flatten(x_nhwc, stride, k=3, pad=1):
    """Zero-pad spatially, split into stride x stride phases, flatten each
    phase row-major and append enough zero rows so that every 3x3 tap of the
    conv is an in-bounds, contiguous, statically-offset row slice.

    Size is ~1x the padded activation (no im2col amplification).  Returns the
    (N, s*s, L, C) array and static metadata (tap offsets, output geometry).
    """
    n, h, w, c = x_nhwc.shape
    s = stride
    hp, wp = h + 2 * pad, w + 2 * pad
    hps, wps = -(-hp // s), -(-wp // s)
    ho, wo = (hp - k) // s + 1, (wp - k) // s + 1
    q = (k - 1) // s
    m_c = _round_up(ho * wps, 16)                 # kernel row count (bf16-tiled)
    l = _round_up(max(m_c + q * wps + q, hps * wps), 8)

    xp = jnp.pad(x_nhwc, ((0, 0), (pad, pad), (pad, pad), (0, 0)))
    xp = jnp.pad(xp, ((0, 0), (0, hps * s - hp), (0, wps * s - wp), (0, 0)))
    xp = xp.reshape(n, hps, s, wps, s, c).transpose(0, 2, 4, 1, 3, 5)
    xp = xp.reshape(n, s * s, hps * wps, c)
    xp = jnp.pad(xp, ((0, 0), (0, 0), (0, l - hps * wps), (0, 0)))

    # tap (kh, kw) -> (phase index, flat row offset) inside that phase.
    taps = tuple(((kh % s) * s + (kw % s), (kh // s) * wps + (kw // s))
                 for kh in range(k) for kw in range(k))
    meta = dict(ho=ho, wo=wo, wps=wps, m_c=m_c, taps=taps)
    return xp, meta


# ------------------------------- weight prep -------------------------------- #

def _prep_weight3x3(w_oihw, bn, cout_p):
    """PyTorch (Cout,Cin,3,3) -> (3,3,Cin,Cout_p) bf16, BN scale folded in."""
    scale = bn["gamma"] / jnp.sqrt(bn["var"] + _EPS)
    bias = bn["beta"] - bn["mean"] * scale
    wt = jnp.transpose(w_oihw, (2, 3, 1, 0)) * scale          # (3,3,Cin,Cout)
    cout = wt.shape[-1]
    wt = jnp.pad(wt, ((0, 0), (0, 0), (0, 0), (0, cout_p - cout))).astype(jnp.bfloat16)
    b = jnp.pad(bias, (0, cout_p - cout)).reshape(1, cout_p).astype(jnp.float32)
    return wt, b


def _prep_weight1x1(w_oihw, bn, cout_p):
    """PyTorch (Cout,Cin,1,1) -> small (Cin, Cout_p) bf16, BN folded in."""
    scale = bn["gamma"] / jnp.sqrt(bn["var"] + _EPS)
    bias = bn["beta"] - bn["mean"] * scale
    wt = w_oihw[:, :, 0, 0].T * scale                         # (Cin, Cout)
    cout = wt.shape[-1]
    wt = jnp.pad(wt, ((0, 0), (0, cout_p - cout))).astype(jnp.bfloat16)
    b = jnp.pad(bias, (0, cout_p - cout)).reshape(1, cout_p).astype(jnp.float32)
    return wt, b


# ----------------------------- Pallas kernels ------------------------------- #

def _conv_bn_relu_kernel(taps, x_ref, w_ref, b_ref, o_ref):
    """3x3 conv as 9 tap-shifted MXU matmuls; BN folded; + bias; ReLU."""
    m_c = o_ref.shape[0]
    acc = None
    for t, (ph, off) in enumerate(taps):
        lhs = x_ref[ph, pl.ds(off, m_c), :]
        d = jnp.dot(lhs, w_ref[t // 3, t % 3], preferred_element_type=jnp.float32)
        acc = d if acc is None else acc + d
    o_ref[...] = jnp.maximum(acc + b_ref[...], 0.0).astype(o_ref.dtype)


def _conv_bn_relu_ds_kernel(taps, x_ref, w_ref, b_ref, wd_ref, bd_ref,
                            o_ref, r_ref):
    """First 3x3 conv + BN + ReLU, fused with the 1x1/stride downsample conv.

    The 1x1 conv reuses the centre-tap slice that the 3x3 conv already loads
    and matmuls against the small (Cin, Cout_p) weight (no zero padding to K).
    """
    m_c = o_ref.shape[0]
    acc = None
    for t, (ph, off) in enumerate(taps):
        lhs = x_ref[ph, pl.ds(off, m_c), :]
        d = jnp.dot(lhs, w_ref[t // 3, t % 3], preferred_element_type=jnp.float32)
        acc = d if acc is None else acc + d
        if t == 4:  # centre tap (kh, kw) == (1, 1) also feeds the 1x1 conv
            r = jnp.dot(lhs, wd_ref[...], preferred_element_type=jnp.float32)
            r_ref[...] = (r + bd_ref[...]).astype(r_ref.dtype)
    o_ref[...] = jnp.maximum(acc + b_ref[...], 0.0).astype(o_ref.dtype)


def _conv_bn_add_relu_kernel(taps, x_ref, w_ref, b_ref, res_ref, o_ref):
    """Second 3x3 conv + BN + residual add (f32) + final ReLU."""
    m_c = o_ref.shape[0]
    acc = None
    for t, (ph, off) in enumerate(taps):
        lhs = x_ref[ph, pl.ds(off, m_c), :]
        d = jnp.dot(lhs, w_ref[t // 3, t % 3], preferred_element_type=jnp.float32)
        acc = d if acc is None else acc + d
    acc = acc + b_ref[...] + res_ref[...].astype(jnp.float32)
    o_ref[...] = jnp.maximum(acc, 0.0).astype(o_ref.dtype)


# ------------------------------ pallas_call glue ----------------------------- #

def _vmem_limit(block_bytes, acc_bytes):
    return int(min(max(2 * block_bytes + acc_bytes + (4 << 20), 16 << 20),
                   64 << 20))


def _compiler_params(vmem_bytes):
    return pltpu.CompilerParams(dimension_semantics=("parallel", "parallel"),
                                vmem_limit_bytes=int(vmem_bytes))


def _conv1_call(xph, w, b, meta, wd=None, bd=None):
    n, ss, l, cin = xph.shape
    cout_p = w.shape[-1]
    m_c = meta["m_c"]
    tc = 256 if cout_p % 256 == 0 else 128
    grid = (n, cout_p // tc)

    x_spec = pl.BlockSpec((None, ss, l, cin), lambda i, c: (i, 0, 0, 0))
    w_spec = pl.BlockSpec((3, 3, cin, tc), lambda i, c: (0, 0, 0, c))
    b_spec = pl.BlockSpec((1, tc), lambda i, c: (0, c))
    o_spec = pl.BlockSpec((None, m_c, tc), lambda i, c: (i, 0, c))

    block_bytes = ss * l * cin * 2 + 9 * cin * tc * 2 + tc * 4 + m_c * tc * 2
    flops = 2 * n * m_c * 9 * cin * cout_p
    bytes_acc = xph.size * 2 + w.size * 2 + b.size * 4 + n * m_c * cout_p * 2

    if wd is None:
        kernel = functools.partial(_conv_bn_relu_kernel, meta["taps"])
        return pl.pallas_call(
            kernel,
            out_shape=jax.ShapeDtypeStruct((n, m_c, cout_p), jnp.bfloat16),
            grid=grid,
            in_specs=[x_spec, w_spec, b_spec],
            out_specs=o_spec,
            compiler_params=_compiler_params(
                _vmem_limit(block_bytes, m_c * tc * 4)),
            cost_estimate=pl.CostEstimate(flops=flops, transcendentals=0,
                                          bytes_accessed=bytes_acc),
        )(xph, w, b)

    wd_spec = pl.BlockSpec((cin, tc), lambda i, c: (0, c))
    bd_spec = pl.BlockSpec((1, tc), lambda i, c: (0, c))
    r_spec = pl.BlockSpec((None, m_c, tc), lambda i, c: (i, 0, c))
    block_bytes += cin * tc * 2 + tc * 4 + m_c * tc * 2
    flops += 2 * n * m_c * cin * cout_p
    bytes_acc += wd.size * 2 + bd.size * 4 + n * m_c * cout_p * 2

    kernel = functools.partial(_conv_bn_relu_ds_kernel, meta["taps"])
    return pl.pallas_call(
        kernel,
        out_shape=(jax.ShapeDtypeStruct((n, m_c, cout_p), jnp.bfloat16),
                   jax.ShapeDtypeStruct((n, m_c, cout_p), jnp.bfloat16)),
        grid=grid,
        in_specs=[x_spec, w_spec, b_spec, wd_spec, bd_spec],
        out_specs=(o_spec, r_spec),
        compiler_params=_compiler_params(
            _vmem_limit(block_bytes, m_c * tc * 4)),
        cost_estimate=pl.CostEstimate(flops=flops, transcendentals=0,
                                      bytes_accessed=bytes_acc),
    )(xph, w, b, wd, bd)


def _conv2_call(xph, w, b, res, meta):
    n, ss, l, cin = xph.shape
    cout_p = w.shape[-1]
    m_c = meta["m_c"]
    tc = 256 if cout_p % 256 == 0 else 128
    grid = (n, cout_p // tc)

    x_spec = pl.BlockSpec((None, ss, l, cin), lambda i, c: (i, 0, 0, 0))
    w_spec = pl.BlockSpec((3, 3, cin, tc), lambda i, c: (0, 0, 0, c))
    b_spec = pl.BlockSpec((1, tc), lambda i, c: (0, c))
    r_spec = pl.BlockSpec((None, m_c, tc), lambda i, c: (i, 0, c))
    o_spec = pl.BlockSpec((None, m_c, tc), lambda i, c: (i, 0, c))

    block_bytes = (ss * l * cin * 2 + 9 * cin * tc * 2 + tc * 4
                   + m_c * tc * 2 + m_c * tc * 4)
    flops = 2 * n * m_c * 9 * cin * cout_p
    bytes_acc = (xph.size * 2 + w.size * 2 + b.size * 4 + res.size * 2
                 + n * m_c * cout_p * 4)

    kernel = functools.partial(_conv_bn_add_relu_kernel, meta["taps"])
    return pl.pallas_call(
        kernel,
        out_shape=jax.ShapeDtypeStruct((n, m_c, cout_p), jnp.float32),
        grid=grid,
        in_specs=[x_spec, w_spec, b_spec, r_spec],
        out_specs=o_spec,
        compiler_params=_compiler_params(
            _vmem_limit(block_bytes, m_c * tc * 4)),
        cost_estimate=pl.CostEstimate(flops=flops, transcendentals=0,
                                      bytes_accessed=bytes_acc),
    )(xph, w, b, res)


# ------------------------------ forward pass --------------------------------- #

@functools.partial(jax.jit, static_argnums=(2, 3))
def residual_block_forward(x_nchw, params, stride, downsample):
    """Pallas implementation of ResidualBlock.forward (inference-mode BN)."""
    x = jnp.transpose(x_nchw, (0, 2, 3, 1)).astype(jnp.bfloat16)   # NHWC bf16
    n, h, w, cin = x.shape
    cout = params["w1"].shape[0]
    cout_p = _round_up(cout, _LANE)

    if not downsample:
        assert stride == 1 and cin == cout, (
            "identity residual path requires stride == 1 and Cin == Cout")

    # ---- conv1: 3x3 / stride, BN, ReLU (+ fused 1x1/stride downsample) ----
    xph1, m1 = _phase_flatten(x, stride)
    w1, b1 = _prep_weight3x3(params["w1"], params["bn1"], cout_p)
    if downsample:
        wd, bd = _prep_weight1x1(params["wd"], params["bnd"], cout_p)
        y1, res = _conv1_call(xph1, w1, b1, m1, wd=wd, bd=bd)
    else:
        y1 = _conv1_call(xph1, w1, b1, m1)
        res = None

    ho, wo, wps1 = m1["ho"], m1["wo"], m1["wps"]
    y1_img = y1[:, :ho * wps1].reshape(n, ho, wps1, cout_p)[:, :, :wo, :cout]

    # ---- conv2: 3x3 / 1, BN, fused residual add + final ReLU ----
    xph2, m2 = _phase_flatten(y1_img, 1)
    wps2 = m2["wps"]                                        # == wo + 2
    w2, b2 = _prep_weight3x3(params["w2"], params["bn2"], cout_p)

    # Residual, rearranged into conv2's flat (ho, wps2) row layout, bf16.
    if downsample:
        r_img = res[:, :ho * wps1].reshape(n, ho, wps1, cout_p)[:, :, :wo, :]
    else:
        r_img = jnp.pad(x, ((0, 0), (0, 0), (0, 0), (0, cout_p - cin)))
    r_flat = jnp.pad(r_img, ((0, 0), (0, 0), (0, wps2 - wo), (0, 0)))
    r_flat = r_flat.reshape(n, ho * wps2, cout_p)
    r_flat = jnp.pad(r_flat, ((0, 0), (0, m2["m_c"] - ho * wps2), (0, 0)))

    out = _conv2_call(xph2, w2, b2, r_flat, m2)             # f32 (N, m_c2, Cout_p)
    out = out[:, :ho * wps2].reshape(n, ho, wps2, cout_p)[:, :, :wo, :cout]
    return jnp.transpose(out, (0, 3, 1, 2)).astype(jnp.float32)    # NCHW


# ------------------------- pure-JAX reference check -------------------------- #

def _ref_forward(x, params, stride, downsample):
    def conv(x_, w_, s_, p_):
        return lax.conv_general_dilated(
            x_, w_, (s_, s_), [(p_, p_), (p_, p_)],
            dimension_numbers=("NCHW", "OIHW", "NCHW"))

    def bn(x_, p_):
        sc = p_["gamma"] / jnp.sqrt(p_["var"] + _EPS)
        bi = p_["beta"] - p_["mean"] * sc
        return x_ * sc[None, :, None, None] + bi[None, :, None, None]

    y = jnp.maximum(bn(conv(x, params["w1"], stride, 1), params["bn1"]), 0.0)
    y = bn(conv(y, params["w2"], 1, 1), params["bn2"])
    r = x
    if downsample:
        r = bn(conv(x, params["wd"], stride, 0), params["bnd"])
    return jnp.maximum(y + r, 0.0)


# ----------------------------------- main ------------------------------------ #

def _make_bn_params(key, c):
    kg, kb, km, kv = jax.random.split(key, 4)
    return {
        "gamma": jax.random.uniform(kg, (c,), jnp.float32, 0.5, 1.5),
        "beta": jax.random.normal(kb, (c,), jnp.float32) * 0.1,
        "mean": jax.random.normal(km, (c,), jnp.float32) * 0.1,
        "var": jax.random.uniform(kv, (c,), jnp.float32, 0.5, 1.5),
    }


def _run_case(key, n, h, w, cin, cout, stride, downsample):
    keys = jax.random.split(key, 8)
    x = jax.random.normal(keys[0], (n, cin, h, w), jnp.float32)
    params = {
        "w1": jax.random.normal(keys[1], (cout, cin, 3, 3), jnp.float32) * 0.1,
        "w2": jax.random.normal(keys[2], (cout, cout, 3, 3), jnp.float32) * 0.1,
        "bn1": _make_bn_params(keys[4], cout),
        "bn2": _make_bn_params(keys[5], cout),
    }
    if downsample:
        params["wd"] = jax.random.normal(keys[3], (cout, cin, 1, 1),
                                         jnp.float32) * 0.1
        params["bnd"] = _make_bn_params(keys[6], cout)

    out = residual_block_forward(x, params, stride, downsample)
    jax.block_until_ready(out)
    ref = _ref_forward(x, params, stride, downsample)
    # bf16 matmul inputs / bf16 residual (f32 accumulation) -> relaxed tol.
    np.testing.assert_allclose(np.asarray(out), np.asarray(ref),
                               rtol=5e-2, atol=5e-2)


if __name__ == "__main__":
    key = jax.random.PRNGKey(0)
    k1, k2 = jax.random.split(key)

    # Case 1: downsample branch (stride 2, Cin != Cout) — fused 1x1 conv path.
    _run_case(k1, n=2, h=16, w=16, cin=4, cout=8, stride=2, downsample=True)

    # Case 2: identity residual (stride 1, Cin == Cout).
    _run_case(k2, n=2, h=16, w=16, cin=8, cout=8, stride=1, downsample=False)

    print("KERNEL_OK")
</pallas_src>

<mosaic_0001>
module attributes {stable_mosaic.version = 11 : i64} {
  func.func @_conv_bn_relu_ds_kernel(%arg0: i32, %arg1: i32, %arg2: memref<1x4x96x4xbf16, #tpu.memory_space<vmem>>, %arg3: memref<3x3x4x128xbf16, #tpu.memory_space<vmem>>, %arg4: memref<1x128xf32, #tpu.memory_space<vmem>>, %arg5: memref<4x128xbf16, #tpu.memory_space<vmem>>, %arg6: memref<1x128xf32, #tpu.memory_space<vmem>>, %arg7: memref<1x80x128xbf16, #tpu.memory_space<vmem>>, %arg8: memref<1x80x128xbf16, #tpu.memory_space<vmem>>) attributes {dimension_semantics = [#tpu.dimension_semantics<parallel>, #tpu.dimension_semantics<parallel>], iteration_bounds = array<i64: 2, 1>, scalar_prefetch = 0 : i64, scratch_operands = 0 : i64, tpu.core_type = #tpu.core_type<tc>, window_params = [{transform_indices = @transform_0, window_bounds = array<i64: 1, 4, 96, 4>}, {transform_indices = @transform_1, window_bounds = array<i64: 3, 3, 4, 128>}, {transform_indices = @transform_2, window_bounds = array<i64: 1, 128>}, {transform_indices = @transform_3, window_bounds = array<i64: 4, 128>}, {transform_indices = @transform_4, window_bounds = array<i64: 1, 128>}, {transform_indices = @transform_5, window_bounds = array<i64: 1, 80, 128>}, {transform_indices = @transform_6, window_bounds = array<i64: 1, 80, 128>}]} {
    %c0 = arith.constant 0 : index
    %c0_0 = arith.constant 0 : index
    %c0_1 = arith.constant 0 : index
    %c0_2 = arith.constant 0 : index
    %0 = vector.load %arg2[%c0, %c0_0, %c0_1, %c0_2] : memref<1x4x96x4xbf16, #tpu.memory_space<vmem>>, vector<1x1x80x4xbf16>
    %1 = vector.shape_cast %0 : vector<1x1x80x4xbf16> to vector<80x4xbf16>
    %c0_3 = arith.constant 0 : index
    %c0_4 = arith.constant 0 : index
    %c0_5 = arith.constant 0 : index
    %c0_6 = arith.constant 0 : index
    %2 = vector.load %arg3[%c0_3, %c0_4, %c0_5, %c0_6] : memref<3x3x4x128xbf16, #tpu.memory_space<vmem>>, vector<1x1x4x128xbf16>
    %3 = vector.shape_cast %2 : vector<1x1x4x128xbf16> to vector<4x128xbf16>
    %cst = arith.constant dense<0.000000e+00> : vector<80x128xf32>
    %4 = tpu.matmul %1, %3, %cst {dimension_numbers = #tpu.dot_dimension_numbers<[1], [0], [0], [1], [0, 0, 1, 1], [], []>} : vector<80x4xbf16>, vector<4x128xbf16>, vector<80x128xf32> -> vector<80x128xf32>
    %c0_7 = arith.constant 0 : index
    %c1 = arith.constant 1 : index
    %c0_8 = arith.constant 0 : index
    %c0_9 = arith.constant 0 : index
    %5 = vector.load %arg2[%c0_7, %c1, %c0_8, %c0_9] : memref<1x4x96x4xbf16, #tpu.memory_space<vmem>>, vector<1x1x80x4xbf16>
    %6 = vector.shape_cast %5 : vector<1x1x80x4xbf16> to vector<80x4xbf16>
    %c0_10 = arith.constant 0 : index
    %c1_11 = arith.constant 1 : index
    %c0_12 = arith.constant 0 : index
    %c0_13 = arith.constant 0 : index
    %7 = vector.load %arg3[%c0_10, %c1_11, %c0_12, %c0_13] : memref<3x3x4x128xbf16, #tpu.memory_space<vmem>>, vector<1x1x4x128xbf16>
    %8 = vector.shape_cast %7 : vector<1x1x4x128xbf16> to vector<4x128xbf16>
    %cst_14 = arith.constant dense<0.000000e+00> : vector<80x128xf32>
    %9 = tpu.matmul %6, %8, %cst_14 {dimension_numbers = #tpu.dot_dimension_numbers<[1], [0], [0], [1], [0, 0, 1, 1], [], []>} : vector<80x4xbf16>, vector<4x128xbf16>, vector<80x128xf32> -> vector<80x128xf32>
    %10 = arith.addf %4, %9 : vector<80x128xf32>
    %c0_15 = arith.constant 0 : index
    %c0_16 = arith.constant 0 : index
    %c1_17 = arith.constant 1 : index
    %c0_18 = arith.constant 0 : index
    %11 = vector.load %arg2[%c0_15, %c0_16, %c1_17, %c0_18] : memref<1x4x96x4xbf16, #tpu.memory_space<vmem>>, vector<1x1x80x4xbf16>
    %12 = vector.shape_cast %11 : vector<1x1x80x4xbf16> to vector<80x4xbf16>
    %c0_19 = arith.constant 0 : index
    %c2 = arith.constant 2 : index
    %c0_20 = arith.constant 0 : index
    %c0_21 = arith.constant 0 : index
    %13 = vector.load %arg3[%c0_19, %c2, %c0_20, %c0_21] : memref<3x3x4x128xbf16, #tpu.memory_space<vmem>>, vector<1x1x4x128xbf16>
    %14 = vector.shape_cast %13 : vector<1x1x4x128xbf16> to vector<4x128xbf16>
    %cst_22 = arith.constant dense<0.000000e+00> : vector<80x128xf32>
    %15 = tpu.matmul %12, %14, %cst_22 {dimension_numbers = #tpu.dot_dimension_numbers<[1], [0], [0], [1], [0, 0, 1, 1], [], []>} : vector<80x4xbf16>, vector<4x128xbf16>, vector<80x128xf32> -> vector<80x128xf32>
    %16 = arith.addf %10, %15 : vector<80x128xf32>
    %c0_23 = arith.constant 0 : index
    %c2_24 = arith.constant 2 : index
    %c0_25 = arith.constant 0 : index
    %c0_26 = arith.constant 0 : index
    %17 = vector.load %arg2[%c0_23, %c2_24, %c0_25, %c0_26] : memref<1x4x96x4xbf16, #tpu.memory_space<vmem>>, vector<1x1x80x4xbf16>
    %18 = vector.shape_cast %17 : vector<1x1x80x4xbf16> to vector<80x4xbf16>
    %c1_27 = arith.constant 1 : index
    %c0_28 = arith.constant 0 : index
    %c0_29 = arith.constant 0 : index
    %c0_30 = arith.constant 0 : index
    %19 = vector.load %arg3[%c1_27, %c0_28, %c0_29, %c0_30] : memref<3x3x4x128xbf16, #tpu.memory_space<vmem>>, vector<1x1x4x128xbf16>
    %20 = vector.shape_cast %19 : vector<1x1x4x128xbf16> to vector<4x128xbf16>
    %cst_31 = arith.constant dense<0.000000e+00> : vector<80x128xf32>
    %21 = tpu.matmul %18, %20, %cst_31 {dimension_numbers = #tpu.dot_dimension_numbers<[1], [0], [0], [1], [0, 0, 1, 1], [], []>} : vector<80x4xbf16>, vector<4x128xbf16>, vector<80x128xf32> -> vector<80x128xf32>
    %22 = arith.addf %16, %21 : vector<80x128xf32>
    %c0_32 = arith.constant 0 : index
    %c3 = arith.constant 3 : index
    %c0_33 = arith.constant 0 : index
    %c0_34 = arith.constant 0 : index
    %23 = vector.load %arg2[%c0_32, %c3, %c0_33, %c0_34] : memref<1x4x96x4xbf16, #tpu.memory_space<vmem>>, vector<1x1x80x4xbf16>
    %24 = vector.shape_cast %23 : vector<1x1x80x4xbf16> to vector<80x4xbf16>
    %c1_35 = arith.constant 1 : index
    %c1_36 = arith.constant 1 : index
    %c0_37 = arith.constant 0 : index
    %c0_38 = arith.constant 0 : index
    %25 = vector.load %arg3[%c1_35, %c1_36, %c0_37, %c0_38] : memref<3x3x4x128xbf16, #tpu.memory_space<vmem>>, vector<1x1x4x128xbf16>
    %26 = vector.shape_cast %25 : vector<1x1x4x128xbf16> to vector<4x128xbf16>
    %cst_39 = arith.constant dense<0.000000e+00> : vector<80x128xf32>
    %27 = tpu.matmul %24, %26, %cst_39 {dimension_numbers = #tpu.dot_dimension_numbers<[1], [0], [0], [1], [0, 0, 1, 1], [], []>} : vector<80x4xbf16>, vector<4x128xbf16>, vector<80x128xf32> -> vector<80x128xf32>
    %28 = arith.addf %22, %27 : vector<80x128xf32>
    %c0_40 = arith.constant 0 : index
    %c0_41 = arith.constant 0 : index
    %29 = vector.load %arg5[%c0_40, %c0_41] : memref<4x128xbf16, #tpu.memory_space<vmem>>, vector<4x128xbf16>
    %cst_42 = arith.constant dense<0.000000e+00> : vector<80x128xf32>
    %30 = tpu.matmul %24, %29, %cst_42 {dimension_numbers = #tpu.dot_dimension_numbers<[1], [0], [0], [1], [0, 0, 1, 1], [], []>} : vector<80x4xbf16>, vector<4x128xbf16>, vector<80x128xf32> -> vector<80x128xf32>
    %c0_43 = arith.constant 0 : index
    %c0_44 = arith.constant 0 : index
    %31 = vector.load %arg6[%c0_43, %c0_44] : memref<1x128xf32, #tpu.memory_space<vmem>>, vector<1x128xf32>
    %32 = vector.broadcast %31 : vector<1x128xf32> to vector<80x128xf32>
    %33 = arith.addf %30, %32 : vector<80x128xf32>
    %34 = arith.truncf %33 : vector<80x128xf32> to vector<80x128xbf16>
    %c0_45 = arith.constant 0 : index
    %c0_46 = arith.constant 0 : index
    %c0_47 = arith.constant 0 : index
    %35 = vector.load %arg8[%c0_45, %c0_46, %c0_47] : memref<1x80x128xbf16, #tpu.memory_space<vmem>>, vector<1x80x128xbf16>
    %36 = vector.shape_cast %35 : vector<1x80x128xbf16> to vector<80x128xbf16>
    %37 = vector.shape_cast %34 : vector<80x128xbf16> to vector<1x80x128xbf16>
    tpu.vector_store %arg8[%c0_45, %c0_46, %c0_47], %37 {strides = array<i32>} : memref<1x80x128xbf16, #tpu.memory_space<vmem>>, vector<1x80x128xbf16>,
    %c0_48 = arith.constant 0 : index
    %c2_49 = arith.constant 2 : index
    %c1_50 = arith.constant 1 : index
    %c0_51 = arith.constant 0 : index
    %38 = vector.load %arg2[%c0_48, %c2_49, %c1_50, %c0_51] : memref<1x4x96x4xbf16, #tpu.memory_space<vmem>>, vector<1x1x80x4xbf16>
    %39 = vector.shape_cast %38 : vector<1x1x80x4xbf16> to vector<80x4xbf16>
    %c1_52 = arith.constant 1 : index
    %c2_53 = arith.constant 2 : index
    %c0_54 = arith.constant 0 : index
    %c0_55 = arith.constant 0 : index
    %40 = vector.load %arg3[%c1_52, %c2_53, %c0_54, %c0_55] : memref<3x3x4x128xbf16, #tpu.memory_space<vmem>>, vector<1x1x4x128xbf16>
    %41 = vector.shape_cast %40 : vector<1x1x4x128xbf16> to vector<4x128xbf16>
    %cst_56 = arith.constant dense<0.000000e+00> : vector<80x128xf32>
    %42 = tpu.matmul %39, %41, %cst_56 {dimension_numbers = #tpu.dot_dimension_numbers<[1], [0], [0], [1], [0, 0, 1, 1], [], []>} : vector<80x4xbf16>, vector<4x128xbf16>, vector<80x128xf32> -> vector<80x128xf32>
    %43 = arith.addf %28, %42 : vector<80x128xf32>
    %c0_57 = arith.constant 0 : index
    %c0_58 = arith.constant 0 : index
    %c9 = arith.constant 9 : index
    %c0_59 = arith.constant 0 : index
    %44 = vector.load %arg2[%c0_57, %c0_58, %c9, %c0_59] : memref<1x4x96x4xbf16, #tpu.memory_space<vmem>>, vector<1x1x80x4xbf16>
    %45 = vector.shape_cast %44 : vector<1x1x80x4xbf16> to vector<80x4xbf16>
    %c2_60 = arith.constant 2 : index
    %c0_61 = arith.constant 0 : index
    %c0_62 = arith.constant 0 : index
    %c0_63 = arith.constant 0 : index
    %46 = vector.load %arg3[%c2_60, %c0_61, %c0_62, %c0_63] : memref<3x3x4x128xbf16, #tpu.memory_space<vmem>>, vector<1x1x4x128xbf16>
    %47 = vector.shape_cast %46 : vector<1x1x4x128xbf16> to vector<4x128xbf16>
    %cst_64 = arith.constant dense<0.000000e+00> : vector<80x128xf32>
    %48 = tpu.matmul %45, %47, %cst_64 {dimension_numbers = #tpu.dot_dimension_numbers<[1], [0], [0], [1], [0, 0, 1, 1], [], []>} : vector<80x4xbf16>, vector<4x128xbf16>, vector<80x128xf32> -> vector<80x128xf32>
    %49 = arith.addf %43, %48 : vector<80x128xf32>
    %c0_65 = arith.constant 0 : index
    %c1_66 = arith.constant 1 : index
    %c9_67 = arith.constant 9 : index
    %c0_68 = arith.constant 0 : index
    %50 = vector.load %arg2[%c0_65, %c1_66, %c9_67, %c0_68] : memref<1x4x96x4xbf16, #tpu.memory_space<vmem>>, vector<1x1x80x4xbf16>
    %51 = vector.shape_cast %50 : vector<1x1x80x4xbf16> to vector<80x4xbf16>
    %c2_69 = arith.constant 2 : index
    %c1_70 = arith.constant 1 : index
    %c0_71 = arith.constant 0 : index
    %c0_72 = arith.constant 0 : index
    %52 = vector.load %arg3[%c2_69, %c1_70, %c0_71, %c0_72] : memref<3x3x4x128xbf16, #tpu.memory_space<vmem>>, vector<1x1x4x128xbf16>
    %53 = vector.shape_cast %52 : vector<1x1x4x128xbf16> to vector<4x128xbf16>
    %cst_73 = arith.constant dense<0.000000e+00> : vector<80x128xf32>
    %54 = tpu.matmul %51, %53, %cst_73 {dimension_numbers = #tpu.dot_dimension_numbers<[1], [0], [0], [1], [0, 0, 1, 1], [], []>} : vector<80x4xbf16>, vector<4x128xbf16>, vector<80x128xf32> -> vector<80x128xf32>
    %55 = arith.addf %49, %54 : vector<80x128xf32>
    %c0_74 = arith.constant 0 : index
    %c0_75 = arith.constant 0 : index
    %c10 = arith.constant 10 : index
    %c0_76 = arith.constant 0 : index
    %56 = vector.load %arg2[%c0_74, %c0_75, %c10, %c0_76] : memref<1x4x96x4xbf16, #tpu.memory_space<vmem>>, vector<1x1x80x4xbf16>
    %57 = vector.shape_cast %56 : vector<1x1x80x4xbf16> to vector<80x4xbf16>
    %c2_77 = arith.constant 2 : index
    %c2_78 = arith.constant 2 : index
    %c0_79 = arith.constant 0 : index
    %c0_80 = arith.constant 0 : index
    %58 = vector.load %arg3[%c2_77, %c2_78, %c0_79, %c0_80] : memref<3x3x4x128xbf16, #tpu.memory_space<vmem>>, vector<1x1x4x128xbf16>
    %59 = vector.shape_cast %58 : vector<1x1x4x128xbf16> to vector<4x128xbf16>
    %cst_81 = arith.constant dense<0.000000e+00> : vector<80x128xf32>
    %60 = tpu.matmul %57, %59, %cst_81 {dimension_numbers = #tpu.dot_dimension_numbers<[1], [0], [0], [1], [0, 0, 1, 1], [], []>} : vector<80x4xbf16>, vector<4x128xbf16>, vector<80x128xf32> -> vector<80x128xf32>
    %61 = arith.addf %55, %60 : vector<80x128xf32>
    %c0_82 = arith.constant 0 : index
    %c0_83 = arith.constant 0 : index
    %62 = vector.load %arg4[%c0_82, %c0_83] : memref<1x128xf32, #tpu.memory_space<vmem>>, vector<1x128xf32>
    %63 = vector.broadcast %62 : vector<1x128xf32> to vector<80x128xf32>
    %64 = arith.addf %61, %63 : vector<80x128xf32>
    %cst_84 = arith.constant 0.000000e+00 : f32
    %65 = vector.broadcast %cst_84 : f32 to vector<80x128xf32>
    %66 = arith.maximumf %64, %65 : vector<80x128xf32>
    %67 = arith.truncf %66 : vector<80x128xf32> to vector<80x128xbf16>
    %c0_85 = arith.constant 0 : index
    %c0_86 = arith.constant 0 : index
    %c0_87 = arith.constant 0 : index
    %68 = vector.load %arg7[%c0_85, %c0_86, %c0_87] : memref<1x80x128xbf16, #tpu.memory_space<vmem>>, vector<1x80x128xbf16>
    %69 = vector.shape_cast %68 : vector<1x80x128xbf16> to vector<80x128xbf16>
    %70 = vector.shape_cast %67 : vector<80x128xbf16> to vector<1x80x128xbf16>
    tpu.vector_store %arg7[%c0_85, %c0_86, %c0_87], %70 {strides = array<i32>} : memref<1x80x128xbf16, #tpu.memory_space<vmem>>, vector<1x80x128xbf16>,
    return
  }
  func.func @transform_0(%arg0: i32, %arg1: i32) -> (i32, i32, i32, i32) {
    %c0_i32 = arith.constant 0 : i32
    %c0_i32_0 = arith.constant 0 : i32
    %c0_i32_1 = arith.constant 0 : i32
    %c0_i32_2 = arith.constant 0 : i32
    return %arg0, %c0_i32, %c0_i32_0, %c0_i32_1 : i32, i32, i32, i32
  }
  func.func @transform_1(%arg0: i32, %arg1: i32) -> (i32, i32, i32, i32) {
    %c0_i32 = arith.constant 0 : i32
    %c0_i32_0 = arith.constant 0 : i32
    %c0_i32_1 = arith.constant 0 : i32
    %c0_i32_2 = arith.constant 0 : i32
    return %c0_i32, %c0_i32_0, %c0_i32_1, %arg1 : i32, i32, i32, i32
  }
  func.func @transform_2(%arg0: i32, %arg1: i32) -> (i32, i32) {
    %c0_i32 = arith.constant 0 : i32
    %c0_i32_0 = arith.constant 0 : i32
    return %c0_i32, %arg1 : i32, i32
  }
  func.func @transform_3(%arg0: i32, %arg1: i32) -> (i32, i32) {
    %c0_i32 = arith.constant 0 : i32
    %c0_i32_0 = arith.constant 0 : i32
    return %c0_i32, %arg1 : i32, i32
  }
  func.func @transform_4(%arg0: i32, %arg1: i32) -> (i32, i32) {
    %c0_i32 = arith.constant 0 : i32
    %c0_i32_0 = arith.constant 0 : i32
    return %c0_i32, %arg1 : i32, i32
  }
  func.func @transform_5(%arg0: i32, %arg1: i32) -> (i32, i32, i32) {
    %c0_i32 = arith.constant 0 : i32
    %c0_i32_0 = arith.constant 0 : i32
    return %arg0, %c0_i32, %arg1 : i32, i32, i32
  }
  func.func @transform_6(%arg0: i32, %arg1: i32) -> (i32, i32, i32) {
    %c0_i32 = arith.constant 0 : i32
    %c0_i32_0 = arith.constant 0 : i32
    return %arg0, %c0_i32, %arg1 : i32, i32, i32
  }
}

module attributes {stable_mosaic.version = 11 : i64} {
  func.func @_conv_bn_add_relu_kernel(%arg0: i32, %arg1: i32, %arg2: memref<1x1x104x8xbf16, #tpu.memory_space<vmem>>, %arg3: memref<3x3x8x128xbf16, #tpu.memory_space<vmem>>, %arg4: memref<1x128xf32, #tpu.memory_space<vmem>>, %arg5: memref<1x80x128xbf16, #tpu.memory_space<vmem>>, %arg6: memref<1x80x128xf32, #tpu.memory_space<vmem>>) attributes {dimension_semantics = [#tpu.dimension_semantics<parallel>, #tpu.dimension_semantics<parallel>], iteration_bounds = array<i64: 2, 1>, scalar_prefetch = 0 : i64, scratch_operands = 0 : i64, tpu.core_type = #tpu.core_type<tc>, window_params = [{transform_indices = @transform_0, window_bounds = array<i64: 1, 1, 104, 8>}, {transform_indices = @transform_1, window_bounds = array<i64: 3, 3, 8, 128>}, {transform_indices = @transform_2, window_bounds = array<i64: 1, 128>}, {transform_indices = @transform_3, window_bounds = array<i64: 1, 80, 128>}, {transform_indices = @transform_4, window_bounds = array<i64: 1, 80, 128>}]} {
    %c0 = arith.constant 0 : index
    %c0_0 = arith.constant 0 : index
    %c0_1 = arith.constant 0 : index
    %c0_2 = arith.constant 0 : index
    %0 = vector.load %arg2[%c0, %c0_0, %c0_1, %c0_2] : memref<1x1x104x8xbf16, #tpu.memory_space<vmem>>, vector<1x1x80x8xbf16>
    %1 = vector.shape_cast %0 : vector<1x1x80x8xbf16> to vector<80x8xbf16>
    %c0_3 = arith.constant 0 : index
    %c0_4 = arith.constant 0 : index
    %c0_5 = arith.constant 0 : index
    %c0_6 = arith.constant 0 : index
    %2 = vector.load %arg3[%c0_3, %c0_4, %c0_5, %c0_6] : memref<3x3x8x128xbf16, #tpu.memory_space<vmem>>, vector<1x1x8x128xbf16>
    %3 = vector.shape_cast %2 : vector<1x1x8x128xbf16> to vector<8x128xbf16>
    %cst = arith.constant dense<0.000000e+00> : vector<80x128xf32>
    %4 = tpu.matmul %1, %3, %cst {dimension_numbers = #tpu.dot_dimension_numbers<[1], [0], [0], [1], [0, 0, 1, 1], [], []>} : vector<80x8xbf16>, vector<8x128xbf16>, vector<80x128xf32> -> vector<80x128xf32>
    %c0_7 = arith.constant 0 : index
    %c0_8 = arith.constant 0 : index
    %c1 = arith.constant 1 : index
    %c0_9 = arith.constant 0 : index
    %5 = vector.load %arg2[%c0_7, %c0_8, %c1, %c0_9] : memref<1x1x104x8xbf16, #tpu.memory_space<vmem>>, vector<1x1x80x8xbf16>
    %6 = vector.shape_cast %5 : vector<1x1x80x8xbf16> to vector<80x8xbf16>
    %c0_10 = arith.constant 0 : index
    %c1_11 = arith.constant 1 : index
    %c0_12 = arith.constant 0 : index
    %c0_13 = arith.constant 0 : index
    %7 = vector.load %arg3[%c0_10, %c1_11, %c0_12, %c0_13] : memref<3x3x8x128xbf16, #tpu.memory_space<vmem>>, vector<1x1x8x128xbf16>
    %8 = vector.shape_cast %7 : vector<1x1x8x128xbf16> to vector<8x128xbf16>
    %cst_14 = arith.constant dense<0.000000e+00> : vector<80x128xf32>
    %9 = tpu.matmul %6, %8, %cst_14 {dimension_numbers = #tpu.dot_dimension_numbers<[1], [0], [0], [1], [0, 0, 1, 1], [], []>} : vector<80x8xbf16>, vector<8x128xbf16>, vector<80x128xf32> -> vector<80x128xf32>
    %10 = arith.addf %4, %9 : vector<80x128xf32>
    %c0_15 = arith.constant 0 : index
    %c0_16 = arith.constant 0 : index
    %c2 = arith.constant 2 : index
    %c0_17 = arith.constant 0 : index
    %11 = vector.load %arg2[%c0_15, %c0_16, %c2, %c0_17] : memref<1x1x104x8xbf16, #tpu.memory_space<vmem>>, vector<1x1x80x8xbf16>
    %12 = vector.shape_cast %11 : vector<1x1x80x8xbf16> to vector<80x8xbf16>
    %c0_18 = arith.constant 0 : index
    %c2_19 = arith.constant 2 : index
    %c0_20 = arith.constant 0 : index
    %c0_21 = arith.constant 0 : index
    %13 = vector.load %arg3[%c0_18, %c2_19, %c0_20, %c0_21] : memref<3x3x8x128xbf16, #tpu.memory_space<vmem>>, vector<1x1x8x128xbf16>
    %14 = vector.shape_cast %13 : vector<1x1x8x128xbf16> to vector<8x128xbf16>
    %cst_22 = arith.constant dense<0.000000e+00> : vector<80x128xf32>
    %15 = tpu.matmul %12, %14, %cst_22 {dimension_numbers = #tpu.dot_dimension_numbers<[1], [0], [0], [1], [0, 0, 1, 1], [], []>} : vector<80x8xbf16>, vector<8x128xbf16>, vector<80x128xf32> -> vector<80x128xf32>
    %16 = arith.addf %10, %15 : vector<80x128xf32>
    %c0_23 = arith.constant 0 : index
    %c0_24 = arith.constant 0 : index
    %c10 = arith.constant 10 : index
    %c0_25 = arith.constant 0 : index
    %17 = vector.load %arg2[%c0_23, %c0_24, %c10, %c0_25] : memref<1x1x104x8xbf16, #tpu.memory_space<vmem>>, vector<1x1x80x8xbf16>
    %18 = vector.shape_cast %17 : vector<1x1x80x8xbf16> to vector<80x8xbf16>
    %c1_26 = arith.constant 1 : index
    %c0_27 = arith.constant 0 : index
    %c0_28 = arith.constant 0 : index
    %c0_29 = arith.constant 0 : index
    %19 = vector.load %arg3[%c1_26, %c0_27, %c0_28, %c0_29] : memref<3x3x8x128xbf16, #tpu.memory_space<vmem>>, vector<1x1x8x128xbf16>
    %20 = vector.shape_cast %19 : vector<1x1x8x128xbf16> to vector<8x128xbf16>
    %cst_30 = arith.constant dense<0.000000e+00> : vector<80x128xf32>
    %21 = tpu.matmul %18, %20, %cst_30 {dimension_numbers = #tpu.dot_dimension_numbers<[1], [0], [0], [1], [0, 0, 1, 1], [], []>} : vector<80x8xbf16>, vector<8x128xbf16>, vector<80x128xf32> -> vector<80x128xf32>
    %22 = arith.addf %16, %21 : vector<80x128xf32>
    %c0_31 = arith.constant 0 : index
    %c0_32 = arith.constant 0 : index
    %c11 = arith.constant 11 : index
    %c0_33 = arith.constant 0 : index
    %23 = vector.load %arg2[%c0_31, %c0_32, %c11, %c0_33] : memref<1x1x104x8xbf16, #tpu.memory_space<vmem>>, vector<1x1x80x8xbf16>
    %24 = vector.shape_cast %23 : vector<1x1x80x8xbf16> to vector<80x8xbf16>
    %c1_34 = arith.constant 1 : index
    %c1_35 = arith.constant 1 : index
    %c0_36 = arith.constant 0 : index
    %c0_37 = arith.constant 0 : index
    %25 = vector.load %arg3[%c1_34, %c1_35, %c0_36, %c0_37] : memref<3x3x8x128xbf16, #tpu.memory_space<vmem>>, vector<1x1x8x128xbf16>
    %26 = vector.shape_cast %25 : vector<1x1x8x128xbf16> to vector<8x128xbf16>
    %cst_38 = arith.constant dense<0.000000e+00> : vector<80x128xf32>
    %27 = tpu.matmul %24, %26, %cst_38 {dimension_numbers = #tpu.dot_dimension_numbers<[1], [0], [0], [1], [0, 0, 1, 1], [], []>} : vector<80x8xbf16>, vector<8x128xbf16>, vector<80x128xf32> -> vector<80x128xf32>
    %28 = arith.addf %22, %27 : vector<80x128xf32>
    %c0_39 = arith.constant 0 : index
    %c0_40 = arith.constant 0 : index
    %c12 = arith.constant 12 : index
    %c0_41 = arith.constant 0 : index
    %29 = vector.load %arg2[%c0_39, %c0_40, %c12, %c0_41] : memref<1x1x104x8xbf16, #tpu.memory_space<vmem>>, vector<1x1x80x8xbf16>
    %30 = vector.shape_cast %29 : vector<1x1x80x8xbf16> to vector<80x8xbf16>
    %c1_42 = arith.constant 1 : index
    %c2_43 = arith.constant 2 : index
    %c0_44 = arith.constant 0 : index
    %c0_45 = arith.constant 0 : index
    %31 = vector.load %arg3[%c1_42, %c2_43, %c0_44, %c0_45] : memref<3x3x8x128xbf16, #tpu.memory_space<vmem>>, vector<1x1x8x128xbf16>
    %32 = vector.shape_cast %31 : vector<1x1x8x128xbf16> to vector<8x128xbf16>
    %cst_46 = arith.constant dense<0.000000e+00> : vector<80x128xf32>
    %33 = tpu.matmul %30, %32, %cst_46 {dimension_numbers = #tpu.dot_dimension_numbers<[1], [0], [0], [1], [0, 0, 1, 1], [], []>} : vector<80x8xbf16>, vector<8x128xbf16>, vector<80x128xf32> -> vector<80x128xf32>
    %34 = arith.addf %28, %33 : vector<80x128xf32>
    %c0_47 = arith.constant 0 : index
    %c0_48 = arith.constant 0 : index
    %c20 = arith.constant 20 : index
    %c0_49 = arith.constant 0 : index
    %35 = vector.load %arg2[%c0_47, %c0_48, %c20, %c0_49] : memref<1x1x104x8xbf16, #tpu.memory_space<vmem>>, vector<1x1x80x8xbf16>
    %36 = vector.shape_cast %35 : vector<1x1x80x8xbf16> to vector<80x8xbf16>
    %c2_50 = arith.constant 2 : index
    %c0_51 = arith.constant 0 : index
    %c0_52 = arith.constant 0 : index
    %c0_53 = arith.constant 0 : index
    %37 = vector.load %arg3[%c2_50, %c0_51, %c0_52, %c0_53] : memref<3x3x8x128xbf16, #tpu.memory_space<vmem>>, vector<1x1x8x128xbf16>
    %38 = vector.shape_cast %37 : vector<1x1x8x128xbf16> to vector<8x128xbf16>
    %cst_54 = arith.constant dense<0.000000e+00> : vector<80x128xf32>
    %39 = tpu.matmul %36, %38, %cst_54 {dimension_numbers = #tpu.dot_dimension_numbers<[1], [0], [0], [1], [0, 0, 1, 1], [], []>} : vector<80x8xbf16>, vector<8x128xbf16>, vector<80x128xf32> -> vector<80x128xf32>
    %40 = arith.addf %34, %39 : vector<80x128xf32>
    %c0_55 = arith.constant 0 : index
    %c0_56 = arith.constant 0 : index
    %c21 = arith.constant 21 : index
    %c0_57 = arith.constant 0 : index
    %41 = vector.load %arg2[%c0_55, %c0_56, %c21, %c0_57] : memref<1x1x104x8xbf16, #tpu.memory_space<vmem>>, vector<1x1x80x8xbf16>
    %42 = vector.shape_cast %41 : vector<1x1x80x8xbf16> to vector<80x8xbf16>
    %c2_58 = arith.constant 2 : index
    %c1_59 = arith.constant 1 : index
    %c0_60 = arith.constant 0 : index
    %c0_61 = arith.constant 0 : index
    %43 = vector.load %arg3[%c2_58, %c1_59, %c0_60, %c0_61] : memref<3x3x8x128xbf16, #tpu.memory_space<vmem>>, vector<1x1x8x128xbf16>
    %44 = vector.shape_cast %43 : vector<1x1x8x128xbf16> to vector<8x128xbf16>
    %cst_62 = arith.constant dense<0.000000e+00> : vector<80x128xf32>
    %45 = tpu.matmul %42, %44, %cst_62 {dimension_numbers = #tpu.dot_dimension_numbers<[1], [0], [0], [1], [0, 0, 1, 1], [], []>} : vector<80x8xbf16>, vector<8x128xbf16>, vector<80x128xf32> -> vector<80x128xf32>
    %46 = arith.addf %40, %45 : vector<80x128xf32>
    %c0_63 = arith.constant 0 : index
    %c0_64 = arith.constant 0 : index
    %c22 = arith.constant 22 : index
    %c0_65 = arith.constant 0 : index
    %47 = vector.load %arg2[%c0_63, %c0_64, %c22, %c0_65] : memref<1x1x104x8xbf16, #tpu.memory_space<vmem>>, vector<1x1x80x8xbf16>
    %48 = vector.shape_cast %47 : vector<1x1x80x8xbf16> to vector<80x8xbf16>
    %c2_66 = arith.constant 2 : index
    %c2_67 = arith.constant 2 : index
    %c0_68 = arith.constant 0 : index
    %c0_69 = arith.constant 0 : index
    %49 = vector.load %arg3[%c2_66, %c2_67, %c0_68, %c0_69] : memref<3x3x8x128xbf16, #tpu.memory_space<vmem>>, vector<1x1x8x128xbf16>
    %50 = vector.shape_cast %49 : vector<1x1x8x128xbf16> to vector<8x128xbf16>
    %cst_70 = arith.constant dense<0.000000e+00> : vector<80x128xf32>
    %51 = tpu.matmul %48, %50, %cst_70 {dimension_numbers = #tpu.dot_dimension_numbers<[1], [0], [0], [1], [0, 0, 1, 1], [], []>} : vector<80x8xbf16>, vector<8x128xbf16>, vector<80x128xf32> -> vector<80x128xf32>
    %52 = arith.addf %46, %51 : vector<80x128xf32>
    %c0_71 = arith.constant 0 : index
    %c0_72 = arith.constant 0 : index
    %53 = vector.load %arg4[%c0_71, %c0_72] : memref<1x128xf32, #tpu.memory_space<vmem>>, vector<1x128xf32>
    %54 = vector.broadcast %53 : vector<1x128xf32> to vector<80x128xf32>
    %55 = arith.addf %52, %54 : vector<80x128xf32>
    %c0_73 = arith.constant 0 : index
    %c0_74 = arith.constant 0 : index
    %c0_75 = arith.constant 0 : index
    %56 = vector.load %arg5[%c0_73, %c0_74, %c0_75] : memref<1x80x128xbf16, #tpu.memory_space<vmem>>, vector<1x80x128xbf16>
    %57 = vector.shape_cast %56 : vector<1x80x128xbf16> to vector<80x128xbf16>
    %58 = arith.extf %57 : vector<80x128xbf16> to vector<80x128xf32>
    %59 = arith.addf %55, %58 : vector<80x128xf32>
    %cst_76 = arith.constant 0.000000e+00 : f32
    %60 = vector.broadcast %cst_76 : f32 to vector<80x128xf32>
    %61 = arith.maximumf %59, %60 : vector<80x128xf32>
    %c0_77 = arith.constant 0 : index
    %c0_78 = arith.constant 0 : index
    %c0_79 = arith.constant 0 : index
    %62 = vector.load %arg6[%c0_77, %c0_78, %c0_79] : memref<1x80x128xf32, #tpu.memory_space<vmem>>, vector<1x80x128xf32>
    %63 = vector.shape_cast %62 : vector<1x80x128xf32> to vector<80x128xf32>
    %64 = vector.shape_cast %61 : vector<80x128xf32> to vector<1x80x128xf32>
    tpu.vector_store %arg6[%c0_77, %c0_78, %c0_79], %64 {strides = array<i32>} : memref<1x80x128xf32, #tpu.memory_space<vmem>>, vector<1x80x128xf32>,
    return
  }
  func.func @transform_0(%arg0: i32, %arg1: i32) -> (i32, i32, i32, i32) {
    %c0_i32 = arith.constant 0 : i32
    %c0_i32_0 = arith.constant 0 : i32
    %c0_i32_1 = arith.constant 0 : i32
    %c0_i32_2 = arith.constant 0 : i32
    return %arg0, %c0_i32, %c0_i32_0, %c0_i32_1 : i32, i32, i32, i32
  }
  func.func @transform_1(%arg0: i32, %arg1: i32) -> (i32, i32, i32, i32) {
    %c0_i32 = arith.constant 0 : i32
    %c0_i32_0 = arith.constant 0 : i32
    %c0_i32_1 = arith.constant 0 : i32
    %c0_i32_2 = arith.constant 0 : i32
    return %c0_i32, %c0_i32_0, %c0_i32_1, %arg1 : i32, i32, i32, i32
  }
  func.func @transform_2(%arg0: i32, %arg1: i32) -> (i32, i32) {
    %c0_i32 = arith.constant 0 : i32
    %c0_i32_0 = arith.constant 0 : i32
    return %c0_i32, %arg1 : i32, i32
  }
  func.func @transform_3(%arg0: i32, %arg1: i32) -> (i32, i32, i32) {
    %c0_i32 = arith.constant 0 : i32
    %c0_i32_0 = arith.constant 0 : i32
    return %arg0, %c0_i32, %arg1 : i32, i32, i32
  }
  func.func @transform_4(%arg0: i32, %arg1: i32) -> (i32, i32, i32) {
    %c0_i32 = arith.constant 0 : i32
    %c0_i32_0 = arith.constant 0 : i32
    return %arg0, %c0_i32, %arg1 : i32, i32, i32
  }
}

</mosaic_0001>

<bundles_post_ra>
// kernel: residual_block_forward.3
= control target key start
LH: loop header
LB: loop body
LE: loop exit
PB: predicated region body
PF: predicated region fallthrough
CT: control target
= control target key end

     0   :  { %s2192_s15 = smov 0   ;;  %s2194_s16 = smov 0   ;;  %s2639_s0 = inlined_call_operand.vmem [shape: bf16[2,1,104,8], index: 0, kind: input, shape index: {}]   ;;  %s2640_s1 = inlined_call_operand.vmem [shape: bf16[3,3,8,128], index: 1, kind: input, shape index: {}]   ;;  %s2641_s2 = inlined_call_operand.vmem [shape: f32[1,128], index: 2, kind: input, shape index: {}]   ;;  %s2642_s3 = inlined_call_operand.vmem [shape: bf16[2,80,128], index: 3, kind: input, shape index: {}]   ;;  %s2643_s4 = inlined_call_operand.vmem [shape: f32[2,80,128], index: 4, kind: output, shape index: {}]  }
   0x1   :  { %s2196_s17 = smov 0  }
   0x2 LB: > { %s26_s18 = sadd.s32 1, %s2159_s16  ;;  %p1728_p0 = scmp.ge.s32.totalorder %s2163_s17, 1  ;;  %s2163_s17 = sphi %s2196_s17, %s14_s17   ;;  %s2159_s16 = sphi %s2194_s16, %s2645_s16   ;;  %s2155_s15 = sphi %s2192_s15, %s2644_s15  }
   0x3   : > { %p28_p1 = scmp.ge.s32.totalorder %s26_s18, 2  ;;  %p208_p2 = scmp.lt.s32.totalorder %s2163_s17, 3 }
   0x5   : > { %s2647_s18 = smov (%p28_p1, %s26_s18), 0  ;;  %p209_p3 = pnand %p1728_p0, %p208_p2 }
   0x6   : > { %v1732_v0 = vld [vmem:[%s2640_s1 + $0x4] sm:$0xf] (!%p209_p3)  ;;  %vm384_vm0 = vcmask (!%p209_p3), 1043456   ;;  %p252_p4 = scmp.lt.s32.totalorder (!%p209_p3), %s2155_s15, 1  ;;  %v2165_v1 = vmov (!%p209_p3), 0.0   ;;  %vm2166_vm1 = vmmov (!%p209_p3), 0  }
   0x7   : > { %212 = sbr.rel (%p209_p3) target bundleno = 427 (0x1ab), region = 36  ;;  %1889 = vmatprep.subr.bf16.mxu0 (!%p209_p3), %v2165_v1  ;;  %2087 = vmatprep.subr.bf16.mxu1 (!%p209_p3), %v2165_v1  ;;  %v386_v2 = vsel (!%p209_p3), %vm384_vm0, %v1732_v0, 0  ;;  %vm323_vm2 = vsmask.f32 (!%p209_p3), 7424  ;;  %v1749_v13 = vld [vmem:[%s2640_s1 + $0x8] sm:$0xf] (!%p209_p3) }
   0x8   : > { %1890 = vmatpush3.bf16.msra.mxu0 (!%p209_p3), %v386_v2  ;;  %2088 = vmatpush3.bf16.msra.mxu1 (!%p209_p3), %v386_v2  ;;  %vm368_vm3 = vcmask (!%p209_p3), 64512   ;;  %v291_v22 = vld [vmem:[%s2640_s1] sm:$0xf] (!%p209_p3)  ;;  %v581_v26 = vsel (!%p209_p3), %vm384_vm0, %v1749_v13, 0  ;;  %vm553_vm4 = vcmask (!%p209_p3), 1046528   ;;  %vm986_vm6 = vcmask (!%p209_p3), 1045504  }
   0x9   : > { %1891 = vmatprep.mubr.msk.bf16.mxu0 (!%p209_p3), %vm2166_vm1, %v2165_v1  ;;  %1903 = vmatprep.mubr.msk.bf16.mxu1 (!%p209_p3), %vm2166_vm1, %v2165_v1  ;;  %v472_v31 = vsel (!%p209_p3), %vm384_vm0, %v291_v22, 0  ;;  %v1756_v48 = vld [vmem:[%s2640_s1 + $0xc] sm:$0xf] (!%p209_p3)  ;;  %v1768_v53 = vld [vmem:[%s2640_s1 + $0x10] sm:$0xf] (!%p209_p3)  ;;  %vm1419_vm8 = vcmask (!%p209_p3), 1044480  }
   0xa   : > { %1933 = vmatprep.subr.bf16.mxu0 (!%p209_p3), %v2165_v1  ;;  %1911 = vmatprep.subr.bf16.mxu1 (!%p209_p3), %v2165_v1  ;;  %v734_v50 = vsel (!%p209_p3), %vm384_vm0, %v1756_v48, 0  ;;  %v895_v55 = vsel (!%p209_p3), %vm384_vm0, %v1768_v53, 0  ;;  %vm825_vm5 = vsmask.f32 (!%p209_p3), 6400  ;;  %vm1258_vm7 = vsmask.f32 (!%p209_p3), 5376 }
   0xe   : > { %s2649_s15 = smov (!%p252_p4, %s2155_s15), 1 }
   0xf   : > { %s2089_s21 = smul.u32 52, %s2649_s15 }
  0x10   : > { %s2090_s19 = smul.u32 40, %s2649_s15 }
  0x11   : > { %s2228_s24 = scalar_lea.vmem %s2639_s0, %s2089_s21  ;;  %s2091_s25 = smul.u32 80, %s2649_s15 }
  0x12   : > { %v281_v3 = vld [vmem:[%s2228_s24] sm:$0xf]  ;;  %v2232_v4 = vld [vmem:[%s2228_s24 + $0x4] sm:$0xf]  ;;  %v2238_v6 = vld [vmem:[%s2228_s24 + $0x8] sm:$0xff]   ;;  %s2586_s22 = scalar_lea.vmem %s2642_s3, %s2090_s19 }
  0x13   : > { %v2235_v5 = vcombine.low %v281_v3, %v2232_v4  ;;  %v332_v9 = vshll.u32 %v2238_v6, 16  ;;  %v2244_v10 = vld [vmem:[%s2228_s24 + $0x18] sm:$0xff]   ;;  %v2247_v11 = vld [vmem:[%s2228_s24 + $0x20] sm:$0xff]   ;;  %v2250_v12 = vld [vmem:[%s2228_s24 + $0x10] sm:$0xff]   ;;  %v336_v23 = vshrl.u32 %v2238_v6, 16  ;;  %v555_v52 = vrot.slane %v2238_v6, 1  ;;  %s2600_s28 = scalar_lea.vmem %s2643_s4, %s2091_s25 }
  0x14   : > { %v348_v16 = vshll.u32 %v2244_v10, 16  ;;  %v352_v17 = vshrl.u32 %v2244_v10, 16  ;;  %v356_v18 = vshll.u32 %v2247_v11, 16  ;;  %v2259_v19 = vld [vmem:[%s2228_s24 + $0x28] ss:$0 sps:$4 sm:$0x11]  }
  0x15   : > { %v325_v7 = vshrl.u32 %v2235_v5, 16  ;;  %v327_v8 = vshll.u32 %v2235_v5, 16  ;;  %v334_v15 = vrot.slane %v332_v9, 1  ;;  %v340_v24 = vshll.u32 %v2250_v12, 16  ;;  %v2283_v39 = vld [vmem:[%s2228_s24 + $0x24] sm:$0xff]   ;;  %v2354_v2 = vld [vmem:[%s2228_s24 + $0xc] sm:$0xff]  }
  0x16   : > { %v350_v21 = vrot.slane %v348_v16, 1  ;;  %v358_v25 = vrot.slane %v356_v18, 1  ;;  %v360_v29 = vshrl.u32 %v2247_v11, 16  ;;  %v364_v30 = vshll.u32 %v2259_v19, 16  ;;  %v547_v43 = vld [vmem:[%s2228_s24] sm:$0xe] }
  0x17   : > { %v329_v14 = vrot.slane %v327_v8, 1  ;;  %v338_v33 = vor.u32 %v336_v23, %v334_v15  ;;  %v342_v34 = vrot.slane %v340_v24, 1  ;;  %v344_v38 = vshrl.u32 %v2250_v12, 16  ;;  %v2130_v40 = vld [vmem:[%s2228_s24 + $0x2c] ss:$0 sps:$4 sm:$0x11]  }
  0x18   : > { %v354_v28 = vor.u32 %v352_v17, %v350_v21  ;;  %v362_v35 = vor.u32 %v360_v29, %v358_v25  ;;  %v366_v36 = vrot.slane %v364_v30, 1  ;;  %v714_v44 = vrot.slane %v2283_v39, 1  ;;  %v666_v61 = vld [vmem:[%s2228_s24 + $0x4] sm:$0xe]  ;;  %v2349_v62 = vld [vmem:[%s2228_s24 + $0x8] sm:$0xf] }
  0x19   : > { %v330_v20 = vor.u32 %v329_v14, %v325_v7  ;;  %v343_v37 = vsel %vm323_vm2, %v338_v33, %v342_v34  ;;  %v346_v42 = vor.u32 %v344_v38, %v342_v34  ;;  %v716_v45 = vrot.slane %v2130_v40, 1  ;;  %v2373_v18 = vld [vmem:[%s2228_s24 + $0x14] sm:$0xff]   ;;  %v2393_v30 = vld [vmem:[%s2228_s24 + $0x1c] sm:$0xff]   ;;  %v2417_v48 = vld [vmem:[%s2228_s24 + $0x2c] ss:$0 sps:$4 sm:$0x33]  }
  0x1a   : > { %v359_v32 = vsel %vm323_vm2, %v354_v28, %v358_v25  ;;  %v367_v41 = vsel %vm323_vm2, %v362_v35, %v366_v36  ;;  %v1750_v49 = vcombine.low %v547_v43, %v2232_v4  ;;  %v557_v56 = vrot.slane %v2250_v12, 1  ;;  %v1782_v24 = vld [vmem:[%s2640_s1 + $0x18] sm:$0xf]  ;;  %v980_v53 = vld [vmem:[%s2228_s24 + $0x4] sm:$0xc] }
  0x1b   : > { %v335_v27 = vsel %vm323_vm2, %v330_v20, %v334_v15  ;;  %1904 = vmatmul.mubr.msk.bf16.vlgmr.msra.gmra.mrb[0].mxu1 %vm368_vm3, %v359_v32  ;;  %v2298_v46 = vsel %vm553_vm4, %v714_v44, %v716_v45  ;;  %v351_v47 = vsel %vm323_vm2, %v346_v42, %v350_v21  ;;  %v559_v58 = vrot.slane %v2244_v10, 1 }
  0x1c   : > { %1892 = vmatmul.mubr.msk.bf16.vlgmr.msra.gmra.mrb[0].mxu0 %vm368_vm3, %v335_v27  ;;  %1912 = vmatpush3.bf16.msra.mxu1 %v472_v31  ;;  %v554_v51 = vrot.slane %v1750_v49, 1  ;;  %v558_v57 = vsel %vm553_vm4, %v555_v52, %v557_v56  ;;  %v561_v60 = vrot.slane %v2247_v11, 1  ;;  %v1757_v0 = vcombine.low %v666_v61, %v2349_v62 }
  0x1d   : > { %1934 = vmatpush3.bf16.msra.mxu0 %v581_v26  ;;  %1895 = vmatprep.mubr.msk.bf16.mxu0 %vm2166_vm1, %v2165_v1  ;;  %v560_v59 = vsel %vm553_vm4, %v557_v56, %v559_v58  ;;  %v563_v3 = vrot.slane %v2259_v19, 1  ;;  %v838_v7 = vshll.u32 %v2354_v2, 16  ;;  %v708_v9 = vrot.slane %v2354_v2, 1 }
  0x1e   : > { %1977 = vmatprep.subr.bf16.mxu0 %v2165_v1  ;;  %1907 = vmatprep.mubr.msk.bf16.mxu1 %vm2166_vm1, %v2165_v1  ;;  %v556_v54 = vsel %vm553_vm4, %v554_v51, %v555_v52  ;;  %v562_v63 = vsel %vm553_vm4, %v559_v58, %v561_v60  ;;  %v827_v4 = vshrl.u32 %v1757_v0, 16  ;;  %v707_v8 = vrot.slane %v1757_v0, 1  ;;  %v1099_v58 = vld [vmem:[%s2228_s24 + $0x8] sm:$0xc] }
  0x1f   : > { %1955 = vmatprep.subr.bf16.mxu1 %v2165_v1  ;;  %v840_v16 = vrot.slane %v838_v7, 2  ;;  %v844_v21 = vshrl.u32 %v2373_v18, 16  ;;  %v847_v22 = vshll.u32 %v2373_v18, 16  ;;  %v710_v23 = vrot.slane %v2373_v18, 1  ;;  %v1801_v7 = vld [vmem:[%s2640_s1 + $0x20] sm:$0xf] }
  0x20   : > { %v829_v13 = vrot.slane %v827_v4, 1  ;;  %v709_v17 = vsel %vm553_vm4, %v707_v8, %v708_v9  ;;  %v1167_v28 = vsel %vm384_vm0, %v1782_v24, 0  ;;  %v853_v32 = vshrl.u32 %v2393_v30, 16 }
  0x21   : > { %v846_v26 = vrot.slane %v844_v21, 1  ;;  %v849_v27 = vrot.slane %v847_v22, 2  ;;  %v711_v29 = vsel %vm553_vm4, %v708_v9, %v710_v23  ;;  %v856_v33 = vshll.u32 %v2393_v30, 16  ;;  %v2468_v9 = vld [vmem:[%s2228_s24 + $0x18] sm:$0xff]  }
  0x22   : > { %v712_v34 = vrot.slane %v2393_v30, 1  ;;  %v855_v36 = vrot.slane %v853_v32, 1  ;;  %v865_v42 = vshll.u32 %v2283_v39, 16  ;;  %v871_v51 = vshrl.u32 %v2417_v48, 16 }
  0x23   : > { %1908 = vmatmul.mubr.msk.bf16.gmra.mrb[4].mxu1 %vm368_vm3, %v367_v41  ;;  %v850_v31 = vor.u32 %v849_v27, %v846_v26  ;;  %v862_v41 = vshrl.u32 %v2283_v39, 16  ;;  %v874_v52 = vshll.u32 %v2417_v48, 16  ;;  %v1776_v56 = vcombine.low %v980_v53, %v2349_v62 }
  0x24   : > { %1896 = vmatmul.mubr.msk.bf16.gmra.mrb[4].mxu0 %vm368_vm3, %v343_v37  ;;  %1913 = vmatprep.mubr.msk.bf16.mxu1 %vm2166_vm1, %v2165_v1  ;;  %v858_v37 = vrot.slane %v856_v33, 2  ;;  %v713_v38 = vsel %vm553_vm4, %v710_v23, %v712_v34  ;;  %v715_v49 = vsel %vm553_vm4, %v712_v34, %v714_v44  ;;  %v988_v61 = vrot.slane %v2354_v2, 2 }
  0x25   : > { %1899 = vmatprep.mubr.msk.bf16.mxu0 %vm2166_vm1, %v2165_v1  ;;  %v864_v45 = vrot.slane %v862_v41, 1  ;;  %v996_v23 = vrot.slane %v2417_v48, 2 }
  0x26   : > { %v859_v40 = vor.u32 %v858_v37, %v855_v36 }
  0x28   : > { %v860_v43 = vsel %vm825_vm5, %v850_v31, %v859_v40 }
  0x2b   : > { %1914 = vmatmul.mubr.msk.bf16.vlgmr.msra.gmra.mrb[8].mxu1 %vm368_vm3, %v2235_v5  ;;  %v830_v5 = vshll.u32 %v1757_v0, 16 }
  0x2c   : > { %1900 = vmatmul.mubr.msk.bf16.gmra.mrb[8].mxu0 %vm368_vm3, %v351_v47  ;;  %1956 = vmatpush3.bf16.msra.mxu1 %v734_v50  ;;  %v867_v47 = vrot.slane %v865_v42, 2 }
  0x2d   : > { %1935 = vmatprep.mubr.msk.bf16.mxu0 %vm2166_vm1, %v2165_v1  ;;  %1917 = vmatprep.mubr.msk.bf16.mxu1 %vm2166_vm1, %v2165_v1  ;;  %v832_v14 = vrot.slane %v830_v5, 2 }
  0x2e   : > { %1999 = vmatprep.subr.bf16.mxu1 %v2165_v1  ;;  %v868_v50 = vor.u32 %v867_v47, %v864_v45 }
  0x2f   : > { %v833_v19 = vor.u32 %v832_v14, %v829_v13  ;;  %v1143_v13 = vrot.slane %v2468_v9, 2  ;;  %v992_v14 = vrot.slane %v2393_v30, 2 }
  0x30   : > { %v869_v44 = vsel %vm825_vm5, %v859_v40, %v868_v50  ;;  %v1280_v40 = vshll.u32 %v2468_v9, 16 }
  0x32   : > { %v1282_v47 = vrot.slane %v1280_v40, 3 }
  0x33   : > { %1918 = vmatmul.mubr.msk.bf16.gmra.mrb[12].mxu1 %vm368_vm3, %v2238_v6  ;;  %v835_v6 = vshrl.u32 %v2354_v2, 16 }
  0x34   : > { %1936 = vmatmul.mubr.msk.bf16.vlgmr.msra.gmra.mrb[12].mxu0 %vm368_vm3, %v556_v54  ;;  %1921 = vmatprep.mubr.msk.bf16.mxu1 %vm2166_vm1, %v2165_v1  ;;  %v873_v54 = vrot.slane %v871_v51, 1 }
  0x35   : > { %1978 = vmatpush3.bf16.msra.mxu0 %v895_v55  ;;  %1939 = vmatprep.mubr.msk.bf16.mxu0 %vm2166_vm1, %v2165_v1  ;;  %v837_v15 = vrot.slane %v835_v6, 1  ;;  %v876_v55 = vrot.slane %v874_v52, 2  ;;  %v990_v6 = vrot.slane %v2373_v18, 2 }
  0x36   : > { %2021 = vmatprep.subr.bf16.mxu0 %v2165_v1 }
  0x37   : > { %v841_v20 = vor.u32 %v840_v16, %v837_v15  ;;  %v2482_v16 = vld [vmem:[%s2228_s24 + $0x20] sm:$0xff]  }
  0x38   : > { %v1145_v18 = vrot.slane %v2482_v16, 2  ;;  %v1286_v51 = vshrl.u32 %v2482_v16, 16  ;;  %v1289_v52 = vshll.u32 %v2482_v16, 16 }
  0x39   : > { %v842_v25 = vsel %vm825_vm5, %v833_v19, %v841_v20  ;;  %v851_v35 = vsel %vm825_vm5, %v841_v20, %v850_v31  ;;  %v2495_v20 = vld [vmem:[%s2228_s24 + $0x28] sm:$0xff]  }
  0x3a   : > { %v1146_v19 = vsel %vm986_vm6, %v1143_v13, %v1145_v18  ;;  %v1147_v22 = vrot.slane %v2495_v20, 2 }
  0x3b   : > { %1922 = vmatmul.mubr.msk.bf16.gmra.mrb[16].mxu1 %vm368_vm3, %v2250_v12  ;;  %v1775_v12 = vld [vmem:[%s2640_s1 + $0x14] sm:$0xf] }
  0x3c   : > { %1940 = vmatmul.mubr.msk.bf16.gmra.mrb[16].mxu0 %vm368_vm3, %v558_v57  ;;  %1925 = vmatprep.mubr.msk.bf16.mxu1 %vm2166_vm1, %v2165_v1  ;;  %v877_v57 = vor.u32 %v876_v55, %v873_v54  ;;  %v1148_v27 = vsel %vm986_vm6, %v1145_v18, %v1147_v22  ;;  %v1288_v54 = vrot.slane %v1286_v51, 2  ;;  %v1291_v55 = vrot.slane %v1289_v52, 3 }
  0x3d   : > { %1943 = vmatprep.mubr.msk.bf16.mxu0 %vm2166_vm1, %v2165_v1 }
  0x3e   : > { %v878_v62 = vsel %vm825_vm5, %v868_v50, %v877_v57  ;;  %v1292_v57 = vor.u32 %v1291_v55, %v1288_v54 }
  0x43   : > { %1926 = vmatmul.mubr.msk.bf16.gmra.mrb[20].mxu1 %vm368_vm3, %v2244_v10  ;;  %v564_v10 = vsel %vm553_vm4, %v561_v60, %v563_v3  ;;  %v987_v60 = vrot.slane %v1776_v56, 2  ;;  %v1423_v56 = vrot.slane %v2468_v9, 3 }
  0x44   : > { %1944 = vmatmul.mubr.msk.bf16.gmra.mrb[20].mxu0 %vm368_vm3, %v560_v59  ;;  %1929 = vmatprep.mubr.msk.bf16.mxu1 %vm2166_vm1, %v2165_v1  ;;  %v2440_v59 = vld [vmem:[%s2228_s24 + $0xc] sm:$0xf] }
  0x45   : > { %1947 = vmatprep.mubr.msk.bf16.mxu0 %vm2166_vm1, %v2165_v1  ;;  %v1783_v0 = vcombine.low %v1099_v58, %v2440_v59  ;;  %v989_v3 = vsel %vm986_vm6, %v987_v60, %v988_v61  ;;  %v1295_v58 = vshrl.u32 %v2495_v20, 16 }
  0x47   : > { %v1140_v2 = vrot.slane %v1783_v0, 2  ;;  %v1263_v24 = vshll.u32 %v1783_v0, 16 }
  0x49   : > { %v1265_v31 = vrot.slane %v1263_v24, 3 }
  0x4b   : > { %1930 = vmatmul.mubr.msk.bf16.gmra.mrb[24].mxu1 %vm368_vm3, %v2247_v11  ;;  %v1014_v11 = vsel %vm384_vm0, %v1775_v12, 0  ;;  %v991_v12 = vsel %vm986_vm6, %v988_v61, %v990_v6 }
  0x4c   : > { %1948 = vmatmul.mubr.msk.bf16.gmra.mrb[24].mxu0 %vm368_vm3, %v562_v63  ;;  %1957 = vmatprep.mubr.msk.bf16.mxu1 %vm2166_vm1, %v2165_v1  ;;  %v1794_v63 = vld [vmem:[%s2640_s1 + $0x1c] sm:$0xf] }
  0x4d   : > { %1951 = vmatprep.mubr.msk.bf16.mxu0 %vm2166_vm1, %v2165_v1  ;;  %v1328_v4 = vsel %vm384_vm0, %v1794_v63, 0 }
  0x53   : > { %1958 = vmatmul.mubr.msk.bf16.vlgmr.msra.gmra.mrb[28].mxu1 %vm368_vm3, %v709_v17  ;;  %v993_v17 = vsel %vm986_vm6, %v990_v6, %v992_v14 }
  0x54   : > { %1952 = vmatmul.mubr.msk.bf16.gmra.mrb[28].mxu0 %vm368_vm3, %v564_v10  ;;  %2000 = vmatpush3.bf16.msra.mxu1 %v1014_v11  ;;  %v1447_v10 = vsel %vm384_vm0, %v1801_v7, 0  ;;  %v994_v11 = vrot.slane %v2283_v39, 2  ;;  %v1260_v39 = vshrl.u32 %v1783_v0, 16  ;;  %v2140_v0 = vld [vmem:[%s2228_s24 + $0x30] ss:$0 sps:$4 sm:$0x77]  }
  0x55   : > { %1979 = vmatprep.mubr.msk.bf16.mxu0 %vm2166_vm1, %v2165_v1  ;;  %1961 = vmatprep.mubr.msk.bf16.mxu1 %vm2166_vm1, %v2165_v1 }
  0x56   : > { %2043 = vmatprep.subr.bf16.mxu1 %v2165_v1  ;;  %v995_v21 = vsel %vm986_vm6, %v992_v14, %v994_v11  ;;  %v1262_v30 = vrot.slane %v1260_v39, 2  ;;  %v1429_v14 = vrot.slane %v2140_v0, 3 }
  0x58   : > { %v1266_v36 = vor.u32 %v1265_v31, %v1262_v30 }
  0x5b   : > { %1962 = vmatmul.mubr.msk.bf16.gmra.mrb[32].mxu1 %vm368_vm3, %v711_v29  ;;  %v997_v29 = vsel %vm986_vm6, %v994_v11, %v996_v23 }
  0x5c   : > { %1980 = vmatmul.mubr.msk.bf16.vlgmr.msra.gmra.mrb[32].mxu0 %vm368_vm3, %v842_v25  ;;  %1965 = vmatprep.mubr.msk.bf16.mxu1 %vm2166_vm1, %v2165_v1 }
  0x5d   : > { %2022 = vmatpush3.bf16.msra.mxu0 %v1167_v28  ;;  %1983 = vmatprep.mubr.msk.bf16.mxu0 %vm2166_vm1, %v2165_v1  ;;  %v2138_v28 = vld [vmem:[%s2228_s24 + $0x30] ss:$0 sps:$4 sm:$0x33]  }
  0x5e   : > { %2065 = vmatprep.subr.bf16.mxu0 %v2165_v1  ;;  %v1149_v34 = vrot.slane %v2138_v28, 2 }
  0x60   : > { %v1150_v41 = vsel %vm986_vm6, %v1147_v22, %v1149_v34 }
  0x63   : > { %1966 = vmatmul.mubr.msk.bf16.gmra.mrb[36].mxu1 %vm368_vm3, %v713_v38  ;;  %v1277_v38 = vshrl.u32 %v2468_v9, 16  ;;  %v1427_v9 = vrot.slane %v2495_v20, 3 }
  0x64   : > { %1984 = vmatmul.mubr.msk.bf16.gmra.mrb[36].mxu0 %vm368_vm3, %v851_v35  ;;  %1969 = vmatprep.mubr.msk.bf16.mxu1 %vm2166_vm1, %v2165_v1  ;;  %v1413_v35 = vld [vmem:[%s2228_s24 + $0x8] sm:$0x8] }
  0x65   : > { %1987 = vmatprep.mubr.msk.bf16.mxu0 %vm2166_vm1, %v2165_v1  ;;  %v1802_v42 = vcombine.low %v1413_v35, %v2440_v59  ;;  %v1279_v45 = vrot.slane %v1277_v38, 2  ;;  %v1298_v59 = vshll.u32 %v2495_v20, 16 }
  0x67   : > { %v1420_v48 = vrot.slane %v1802_v42, 3  ;;  %v1283_v50 = vor.u32 %v1282_v47, %v1279_v45  ;;  %v1300_v63 = vrot.slane %v1298_v59, 3 }
  0x69   : > { %v1293_v61 = vsel %vm1258_vm7, %v1283_v50, %v1292_v57 }
  0x6b   : > { %1970 = vmatmul.mubr.msk.bf16.gmra.mrb[40].mxu1 %vm368_vm3, %v715_v49 }
  0x6c   : > { %1988 = vmatmul.mubr.msk.bf16.gmra.mrb[40].mxu0 %vm368_vm3, %v860_v43  ;;  %1973 = vmatprep.mubr.msk.bf16.mxu1 %vm2166_vm1, %v2165_v1 }
  0x6d   : > { %1991 = vmatprep.mubr.msk.bf16.mxu0 %vm2166_vm1, %v2165_v1 }
  0x73   : > { %1974 = vmatmul.mubr.msk.bf16.gmra.mrb[44].mxu1 %vm368_vm3, %v2298_v46  ;;  %v2451_v46 = vld [vmem:[%s2228_s24 + $0x10] sm:$0xff]  }
  0x74   : > { %1992 = vmatmul.mubr.msk.bf16.gmra.mrb[44].mxu0 %vm368_vm3, %v869_v44  ;;  %2001 = vmatprep.mubr.msk.bf16.mxu1 %vm2166_vm1, %v2165_v1  ;;  %v1141_v5 = vrot.slane %v2451_v46, 2  ;;  %v1268_v25 = vshrl.u32 %v2451_v46, 16  ;;  %v1271_v26 = vshll.u32 %v2451_v46, 16  ;;  %v1421_v49 = vrot.slane %v2451_v46, 3 }
  0x75   : > { %1995 = vmatprep.mubr.msk.bf16.mxu0 %vm2166_vm1, %v2165_v1  ;;  %v1425_v46 = vrot.slane %v2482_v16, 3 }
  0x76   : > { %v1142_v8 = vsel %vm986_vm6, %v1140_v2, %v1141_v5  ;;  %v1144_v15 = vsel %vm986_vm6, %v1141_v5, %v1143_v13  ;;  %v1270_v32 = vrot.slane %v1268_v25, 2  ;;  %v1273_v33 = vrot.slane %v1271_v26, 3 }
  0x77   : > { %v1422_v53 = vsel %vm1419_vm8, %v1420_v48, %v1421_v49  ;;  %v1424_v60 = vsel %vm1419_vm8, %v1421_v49, %v1423_v56  ;;  %v1307_v2 = vshll.u32 %v2140_v0, 16  ;;  %v1426_v5 = vsel %vm1419_vm8, %v1423_v56, %v1425_v46 }
  0x78   : > { %v1274_v37 = vor.u32 %v1273_v33, %v1270_v32 }
  0x7a   : > { %v1275_v43 = vsel %vm1258_vm7, %v1266_v36, %v1274_v37  ;;  %v1284_v44 = vsel %vm1258_vm7, %v1274_v37, %v1283_v50 }
  0x7b   : > { %2002 = vmatmul.mubr.msk.bf16.vlgmr.msra.gmra.mrb[48].mxu1 %vm368_vm3, %v989_v3 }
  0x7c   : > { %1996 = vmatmul.mubr.msk.bf16.gmra.mrb[48].mxu0 %vm368_vm3, %v878_v62  ;;  %2044 = vmatpush3.bf16.msra.mxu1 %v1328_v4  ;;  %v1297_v62 = vrot.slane %v1295_v58, 2  ;;  %v1304_v4 = vshrl.u32 %v2140_v0, 16 }
  0x7d   : > { %2023 = vmatprep.mubr.msk.bf16.mxu0 %vm2166_vm1, %v2165_v1  ;;  %2005 = vmatprep.mubr.msk.bf16.mxu1 %vm2166_vm1, %v2165_v1 }
  0x7e   : > { %v1301_v3 = vor.u32 %v1300_v63, %v1297_v62  ;;  %v1306_v7 = vrot.slane %v1304_v4, 2 }
  0x80   : > { %v1302_v6 = vsel %vm1258_vm7, %v1292_v57, %v1301_v3 }
  0x83   : > { %2006 = vmatmul.mubr.msk.bf16.gmra.mrb[52].mxu1 %vm368_vm3, %v991_v12  ;;  %v1428_v12 = vsel %vm1419_vm8, %v1425_v46, %v1427_v9 }
  0x84   : > { %2024 = vmatmul.mubr.msk.bf16.vlgmr.msra.gmra.mrb[52].mxu0 %vm368_vm3, %v1142_v8  ;;  %2009 = vmatprep.mubr.msk.bf16.mxu1 %vm2166_vm1, %v2165_v1  ;;  %v1309_v8 = vrot.slane %v1307_v2, 3 }
  0x85   : > { %2066 = vmatpush3.bf16.msra.mxu0 %v1447_v10  ;;  %2027 = vmatprep.mubr.msk.bf16.mxu0 %vm2166_vm1, %v2165_v1 }
  0x86   : > { %v1310_v10 = vor.u32 %v1309_v8, %v1306_v7 }
  0x88   : > { %v1311_v13 = vsel %vm1258_vm7, %v1301_v3, %v1310_v10 }
  0x8b   : > { %2010 = vmatmul.mubr.msk.bf16.gmra.mrb[56].mxu1 %vm368_vm3, %v993_v17 }
  0x8c   : > { %2028 = vmatmul.mubr.msk.bf16.gmra.mrb[56].mxu0 %vm368_vm3, %v1144_v15  ;;  %2013 = vmatprep.mubr.msk.bf16.mxu1 %vm2166_vm1, %v2165_v1  ;;  %v1430_v15 = vsel %vm1419_vm8, %v1427_v9, %v1429_v14 }
  0x8d   : > { %2031 = vmatprep.mubr.msk.bf16.mxu0 %vm2166_vm1, %v2165_v1 }
  0x93   : > { %2014 = vmatmul.mubr.msk.bf16.gmra.mrb[60].mxu1 %vm368_vm3, %v995_v21 }
  0x94   : > { %2032 = vmatmul.mubr.msk.bf16.gmra.mrb[60].mxu0 %vm368_vm3, %v1146_v19  ;;  %2017 = vmatprep.mubr.msk.bf16.mxu1 %vm2166_vm1, %v2165_v1 }
  0x95   : > { %2035 = vmatprep.mubr.msk.bf16.mxu0 %vm2166_vm1, %v2165_v1 }
  0x9b   : > { %2018 = vmatmul.mubr.msk.bf16.gmra.mrb[64].mxu1 %vm368_vm3, %v997_v29 }
  0x9c   : > { %2036 = vmatmul.mubr.msk.bf16.gmra.mrb[64].mxu0 %vm368_vm3, %v1148_v27  ;;  %2045 = vmatprep.mubr.msk.bf16.mxu1 %vm2166_vm1, %v2165_v1 }
  0x9d   : > { %2039 = vmatprep.mubr.msk.bf16.mxu0 %vm2166_vm1, %v2165_v1 }
  0xa3   : > { %2046 = vmatmul.mubr.msk.bf16.vlgmr.msra.gmra.mrb[68].mxu1 %vm368_vm3, %v1275_v43 }
  0xa4   : > { %2040 = vmatmul.mubr.msk.bf16.gmra.mrb[68].mxu0 %vm368_vm3, %v1150_v41  ;;  %2049 = vmatprep.mubr.msk.bf16.mxu1 %vm2166_vm1, %v2165_v1 }
  0xa5   : > { %2067 = vmatprep.mubr.msk.bf16.mxu0 %vm2166_vm1, %v2165_v1 }
  0xab   : > { %2050 = vmatmul.mubr.msk.bf16.gmra.mrb[72].mxu1 %vm368_vm3, %v1284_v44 }
  0xac   : > { %2068 = vmatmul.mubr.msk.bf16.vlgmr.msra.gmra.mrb[72].mxu0 %vm368_vm3, %v1422_v53  ;;  %2053 = vmatprep.mubr.msk.bf16.mxu1 %vm2166_vm1, %v2165_v1 }
  0xad   : > { %2071 = vmatprep.mubr.msk.bf16.mxu0 %vm2166_vm1, %v2165_v1 }
  0xb3   : > { %2054 = vmatmul.mubr.msk.bf16.gmra.mrb[76].mxu1 %vm368_vm3, %v1293_v61 }
  0xb4   : > { %2072 = vmatmul.mubr.msk.bf16.gmra.mrb[76].mxu0 %vm368_vm3, %v1424_v60  ;;  %2057 = vmatprep.mubr.msk.bf16.mxu1 %vm2166_vm1, %v2165_v1 }
  0xb5   : > { %2075 = vmatprep.mubr.msk.bf16.mxu0 %vm2166_vm1, %v2165_v1 }
  0xbb   : > { %2058 = vmatmul.mubr.msk.bf16.gmra.mrb[80].mxu1 %vm368_vm3, %v1302_v6 }
  0xbc   : > { %2076 = vmatmul.mubr.msk.bf16.gmra.mrb[80].mxu0 %vm368_vm3, %v1426_v5  ;;  %2061 = vmatprep.mubr.msk.bf16.mxu1 %vm2166_vm1, %v2165_v1 }
  0xbd   : > { %2079 = vmatprep.mubr.msk.bf16.mxu0 %vm2166_vm1, %v2165_v1 }
  0xc3   : > { %2062 = vmatmul.mubr.msk.bf16.gmra.mrb[84].mxu1 %vm368_vm3, %v1311_v13 }
  0xc4   : > { %2080 = vmatmul.mubr.msk.bf16.gmra.mrb[84].mxu0 %vm368_vm3, %v1428_v12 }
  0xc5   : > { %2083 = vmatprep.mubr.msk.bf16.mxu0 %vm2166_vm1, %v2165_v1 }
  0xcc   : > { %2084 = vmatmul.mubr.msk.bf16.gmra.mrb[88].mxu0 %vm368_vm3, %v1430_v15 }
  0xee   : > { %v446_v11 = vpop.f32.mrb[0].mxu1 }
  0xef   : > { %v422_v16 = vpop.f32.mrb[0].mxu0  ;;  %v1905_v20 = vpop.f32.mrb[1].mxu1 }
  0xf0   : > { %v1893_v17 = vpop.f32.mrb[1].mxu0  ;;  %v449_v21 = vpop.f32.mrb[2].mxu1 }
  0xf1   : > { %v425_v18 = vpop.f32.mrb[2].mxu0  ;;  %v1906_v22 = vpop.f32.mrb[3].mxu1 }
  0xf2   : > { %v1894_v19 = vpop.f32.mrb[3].mxu0 }
  0xf6   : > { %v454_v25 = vpop.f32.mrb[4].mxu1 }
  0xf7   : > { %v430_v23 = vpop.f32.mrb[4].mxu0  ;;  %v1909_v26 = vpop.f32.mrb[5].mxu1 }
  0xf8   : > { %v1897_v39 = vpop.f32.mrb[5].mxu0  ;;  %v457_v27 = vpop.f32.mrb[6].mxu1 }
  0xf9   : > { %v433_v24 = vpop.f32.mrb[6].mxu0  ;;  %v1910_v28 = vpop.f32.mrb[7].mxu1 }
  0xfa   : > { %v1898_v1 = vpop.f32.mrb[7].mxu0 }
  0xfe   : > { %v508_v31 = vpop.f32.mrb[8].mxu1 }
  0xff   : > { %v438_v29 = vpop.f32.mrb[8].mxu0  ;;  %v509_v33 = vadd.f32 %v508_v31, %v422_v16  ;;  %v1915_v34 = vpop.f32.mrb[9].mxu1 }
 0x100   : > { %v1901_v30 = vpop.f32.mrb[9].mxu0  ;;  %v511_v36 = vpop.f32.mrb[10].mxu1 }
 0x101   : > { %v441_v32 = vpop.f32.mrb[10].mxu0  ;;  %v512_v37 = vadd.f32 %v511_v36, %v425_v18  ;;  %v1916_v38 = vpop.f32.mrb[11].mxu1 }
 0x102   : > { %v1902_v35 = vpop.f32.mrb[11].mxu0 }
 0x106   : > { %v516_v43 = vpop.f32.mrb[12].mxu1 }
 0x107   : > { %v617_v40 = vpop.f32.mrb[12].mxu0  ;;  %v517_v47 = vadd.f32 %v516_v43, %v430_v23  ;;  %v1919_v48 = vpop.f32.mrb[13].mxu1 }
 0x108   : > { %v656_v41 = vadd.f32 %v617_v40, %v509_v33  ;;  %v1937_v42 = vpop.f32.mrb[13].mxu0  ;;  %v519_v51 = vpop.f32.mrb[14].mxu1 }
 0x109   : > { %v620_v45 = vpop.f32.mrb[14].mxu0  ;;  %v520_v52 = vadd.f32 %v519_v51, %v433_v24  ;;  %v1920_v53 = vpop.f32.mrb[15].mxu1 }
 0x10a   : > { %v657_v49 = vadd.f32 %v620_v45, %v512_v37  ;;  %v1938_v50 = vpop.f32.mrb[15].mxu0 }
 0x10e   : > { %v524_v56 = vpop.f32.mrb[16].mxu1 }
 0x10f   : > { %v625_v44 = vpop.f32.mrb[16].mxu0  ;;  %v525_v58 = vadd.f32 %v524_v56, %v438_v29  ;;  %v1923_v59 = vpop.f32.mrb[17].mxu1 }
 0x110   : > { %v658_v54 = vadd.f32 %v625_v44, %v517_v47  ;;  %v1941_v55 = vpop.f32.mrb[17].mxu0  ;;  %v527_v62 = vpop.f32.mrb[18].mxu1 }
 0x111   : > { %v628_v57 = vpop.f32.mrb[18].mxu0  ;;  %v528_v63 = vadd.f32 %v527_v62, %v441_v32  ;;  %v1924_v0 = vpop.f32.mrb[19].mxu1 }
 0x112   : > { %v659_v60 = vadd.f32 %v628_v57, %v520_v52  ;;  %v1942_v61 = vpop.f32.mrb[19].mxu0 }
 0x116   : > { %v532_v2 = vpop.f32.mrb[20].mxu1 }
 0x117   : > { %v633_v46 = vpop.f32.mrb[20].mxu0  ;;  %v533_v6 = vadd.f32 %v532_v2, %v446_v11  ;;  %v1927_v7 = vpop.f32.mrb[21].mxu1 }
 0x118   : > { %v660_v3 = vadd.f32 %v633_v46, %v525_v58  ;;  %v1945_v4 = vpop.f32.mrb[21].mxu0  ;;  %v535_v10 = vpop.f32.mrb[22].mxu1 }
 0x119   : > { %v636_v5 = vpop.f32.mrb[22].mxu0  ;;  %v536_v12 = vadd.f32 %v535_v10, %v449_v21  ;;  %v1928_v13 = vpop.f32.mrb[23].mxu1 }
 0x11a   : > { %v661_v8 = vadd.f32 %v636_v5, %v528_v63  ;;  %v1946_v9 = vpop.f32.mrb[23].mxu0 }
 0x11e   : > { %v540_v17 = vpop.f32.mrb[24].mxu1 }
 0x11f   : > { %v641_v14 = vpop.f32.mrb[24].mxu0  ;;  %v541_v19 = vadd.f32 %v540_v17, %v454_v25  ;;  %v1931_v20 = vpop.f32.mrb[25].mxu1 }
 0x120   : > { %v662_v15 = vadd.f32 %v641_v14, %v533_v6  ;;  %v1949_v16 = vpop.f32.mrb[25].mxu0  ;;  %v543_v39 = vpop.f32.mrb[26].mxu1 }
 0x121   : > { %v644_v18 = vpop.f32.mrb[26].mxu0  ;;  %v544_v24 = vadd.f32 %v543_v39, %v457_v27  ;;  %v1932_v1 = vpop.f32.mrb[27].mxu1 }
 0x122   : > { %v663_v22 = vadd.f32 %v644_v18, %v536_v12  ;;  %v1950_v23 = vpop.f32.mrb[27].mxu0 }
 0x126   : > { %v770_v29 = vpop.f32.mrb[28].mxu1 }
 0x127   : > { %v649_v26 = vpop.f32.mrb[28].mxu0  ;;  %v809_v31 = vadd.f32 %v770_v29, %v656_v41  ;;  %v1959_v21 = vpop.f32.mrb[29].mxu1 }
 0x128   : > { %v664_v11 = vadd.f32 %v649_v26, %v541_v19  ;;  %v1953_v28 = vpop.f32.mrb[29].mxu0  ;;  %v773_v34 = vpop.f32.mrb[30].mxu1 }
 0x129   : > { %v652_v30 = vpop.f32.mrb[30].mxu0  ;;  %v810_v35 = vadd.f32 %v773_v34, %v657_v49  ;;  %v1960_v36 = vpop.f32.mrb[31].mxu1 }
 0x12a   : > { %v665_v32 = vadd.f32 %v652_v30, %v544_v24  ;;  %v1954_v33 = vpop.f32.mrb[31].mxu0 }
 0x12e   : > { %v778_v40 = vpop.f32.mrb[32].mxu1 }
 0x12f   : > { %v931_v37 = vpop.f32.mrb[32].mxu0  ;;  %v811_v43 = vadd.f32 %v778_v40, %v658_v54  ;;  %v1963_v27 = vpop.f32.mrb[33].mxu1 }
 0x130   : > { %v970_v25 = vadd.f32 %v931_v37, %v809_v31  ;;  %v1981_v38 = vpop.f32.mrb[33].mxu0  ;;  %v781_v48 = vpop.f32.mrb[34].mxu1 }
 0x131   : > { %v934_v42 = vpop.f32.mrb[34].mxu0  ;;  %v812_v50 = vadd.f32 %v781_v48, %v659_v60  ;;  %v1964_v51 = vpop.f32.mrb[35].mxu1 }
 0x132   : > { %v971_v45 = vadd.f32 %v934_v42, %v810_v35  ;;  %v1982_v47 = vpop.f32.mrb[35].mxu0 }
 0x136   : > { %v786_v44 = vpop.f32.mrb[36].mxu1 }
 0x137   : > { %v939_v52 = vpop.f32.mrb[36].mxu0  ;;  %v813_v56 = vadd.f32 %v786_v44, %v660_v3  ;;  %v1967_v49 = vpop.f32.mrb[37].mxu1 }
 0x138   : > { %v972_v41 = vadd.f32 %v939_v52, %v811_v43  ;;  %v1985_v53 = vpop.f32.mrb[37].mxu0  ;;  %v789_v59 = vpop.f32.mrb[38].mxu1 }
 0x139   : > { %v942_v55 = vpop.f32.mrb[38].mxu0  ;;  %v814_v61 = vadd.f32 %v789_v59, %v661_v8  ;;  %v1968_v62 = vpop.f32.mrb[39].mxu1 }
 0x13a   : > { %v973_v57 = vadd.f32 %v942_v55, %v812_v50  ;;  %v1986_v58 = vpop.f32.mrb[39].mxu0 }
 0x13e   : > { %v794_v46 = vpop.f32.mrb[40].mxu1 }
 0x13f   : > { %v947_v63 = vpop.f32.mrb[40].mxu0  ;;  %v815_v2 = vadd.f32 %v794_v46, %v662_v15  ;;  %v1971_v60 = vpop.f32.mrb[41].mxu1 }
 0x140   : > { %v974_v54 = vadd.f32 %v947_v63, %v813_v56  ;;  %v1989_v0 = vpop.f32.mrb[41].mxu0  ;;  %v797_v7 = vpop.f32.mrb[42].mxu1 }
 0x141   : > { %v950_v4 = vpop.f32.mrb[42].mxu0  ;;  %v816_v9 = vadd.f32 %v797_v7, %v663_v22  ;;  %v1972_v10 = vpop.f32.mrb[43].mxu1 }
 0x142   : > { %v975_v5 = vadd.f32 %v950_v4, %v814_v61  ;;  %v1990_v6 = vpop.f32.mrb[43].mxu0 }
 0x146   : > { %v802_v14 = vpop.f32.mrb[44].mxu1 }
 0x147   : > { %v955_v12 = vpop.f32.mrb[44].mxu0  ;;  %v817_v17 = vadd.f32 %v802_v14, %v664_v11  ;;  %v1975_v8 = vpop.f32.mrb[45].mxu1 }
 0x148   : > { %v976_v3 = vadd.f32 %v955_v12, %v815_v2  ;;  %v1993_v13 = vpop.f32.mrb[45].mxu0  ;;  %v805_v20 = vpop.f32.mrb[46].mxu1 }
 0x149   : > { %v958_v16 = vpop.f32.mrb[46].mxu0  ;;  %v818_v23 = vadd.f32 %v805_v20, %v665_v32  ;;  %v1976_v39 = vpop.f32.mrb[47].mxu1 }
 0x14a   : > { %v977_v18 = vadd.f32 %v958_v16, %v816_v9  ;;  %v1994_v19 = vpop.f32.mrb[47].mxu0 }
 0x14e   : > { %v1050_v26 = vpop.f32.mrb[48].mxu1 }
 0x14f   : > { %v963_v24 = vpop.f32.mrb[48].mxu0  ;;  %v1089_v29 = vadd.f32 %v1050_v26, %v970_v25  ;;  %v2003_v22 = vpop.f32.mrb[49].mxu1 }
 0x150   : > { %v978_v15 = vadd.f32 %v963_v24, %v817_v17  ;;  %v1997_v1 = vpop.f32.mrb[49].mxu0  ;;  %v1053_v21 = vpop.f32.mrb[50].mxu1 }
 0x151   : > { %v966_v28 = vpop.f32.mrb[50].mxu0  ;;  %v1090_v33 = vadd.f32 %v1053_v21, %v971_v45  ;;  %v2004_v34 = vpop.f32.mrb[51].mxu1 }
 0x152   : > { %v979_v30 = vadd.f32 %v966_v28, %v818_v23  ;;  %v1998_v31 = vpop.f32.mrb[51].mxu0 }
 0x153   : > { %v1812_v31 = vld [vmem:[%s2586_s22] sm:$0xff]  }
 0x156   : > { %v1058_v37 = vpop.f32.mrb[52].mxu1 }
 0x157   : > { %v1203_v35 = vpop.f32.mrb[52].mxu0  ;;  %v1091_v40 = vadd.f32 %v1058_v37, %v972_v41  ;;  %v2007_v32 = vpop.f32.mrb[53].mxu1 }
 0x158   : > { %v1242_v11 = vadd.f32 %v1203_v35, %v1089_v29  ;;  %v2025_v36 = vpop.f32.mrb[53].mxu0  ;;  %v1061_v27 = vpop.f32.mrb[54].mxu1  ;;  %v1813_v35 = vunpack.c.l.bf16 %v1812_v31 }
 0x159   : > { %v1206_v38 = vpop.f32.mrb[54].mxu0  ;;  %v1092_v47 = vadd.f32 %v1061_v27, %v973_v57  ;;  %v2008_v48 = vpop.f32.mrb[55].mxu1 }
 0x15a   : > { %v1243_v42 = vadd.f32 %v1206_v38, %v1090_v33  ;;  %v2026_v43 = vpop.f32.mrb[55].mxu0  ;;  %v2592_v33 = vld [vmem:[%s2641_s2] ss:$0 sm:$0xff] }
 0x15b   : > { %v1814_v43 = vunpack.c.h.bf16 %v1812_v31 }
 0x15e   : > { %v1066_v52 = vpop.f32.mrb[56].mxu1 }
 0x15f   : > { %v1211_v50 = vpop.f32.mrb[56].mxu0  ;;  %v1093_v44 = vadd.f32 %v1066_v52, %v974_v54  ;;  %v2011_v45 = vpop.f32.mrb[57].mxu1 }
 0x160   : > { %v1244_v25 = vadd.f32 %v1211_v50, %v1091_v40  ;;  %v2029_v51 = vpop.f32.mrb[57].mxu0  ;;  %v1069_v49 = vpop.f32.mrb[58].mxu1 }
 0x161   : > { %v1214_v53 = vpop.f32.mrb[58].mxu0  ;;  %v1094_v58 = vadd.f32 %v1069_v49, %v975_v5  ;;  %v2012_v59 = vpop.f32.mrb[59].mxu1 }
 0x162   : > { %v1245_v55 = vadd.f32 %v1214_v53, %v1092_v47  ;;  %v2030_v56 = vpop.f32.mrb[59].mxu0 }
 0x166   : > { %v1074_v63 = vpop.f32.mrb[60].mxu1 }
 0x167   : > { %v1219_v61 = vpop.f32.mrb[60].mxu0  ;;  %v1095_v57 = vadd.f32 %v1074_v63, %v976_v3  ;;  %v2015_v46 = vpop.f32.mrb[61].mxu1 }
 0x168   : > { %v2570_v41 = vadd.f32 %v1219_v61, %v1093_v44  ;;  %v2033_v62 = vpop.f32.mrb[61].mxu0  ;;  %v1077_v60 = vpop.f32.mrb[62].mxu1 }
 0x169   : > { %v1222_v0 = vpop.f32.mrb[62].mxu0  ;;  %v1096_v54 = vadd.f32 %v1077_v60, %v977_v18  ;;  %v2016_v6 = vpop.f32.mrb[63].mxu1 }
 0x16a   : > { %v2572_v4 = vadd.f32 %v1222_v0, %v1094_v58  ;;  %v2034_v2 = vpop.f32.mrb[63].mxu0 }
 0x16e   : > { %v1082_v10 = vpop.f32.mrb[64].mxu1 }
 0x16f   : > { %v1227_v7 = vpop.f32.mrb[64].mxu0  ;;  %v1097_v13 = vadd.f32 %v1082_v10, %v978_v15  ;;  %v2019_v14 = vpop.f32.mrb[65].mxu1  ;;  %v1832_v10 = vld [vmem:[%s2586_s22 + $0x10] sm:$0xff]  }
 0x170   : > { %v2574_v9 = vadd.f32 %v1227_v7, %v1095_v57  ;;  %v2037_v5 = vpop.f32.mrb[65].mxu0  ;;  %v1085_v3 = vpop.f32.mrb[66].mxu1 }
 0x171   : > { %v1230_v12 = vpop.f32.mrb[66].mxu0  ;;  %v1098_v8 = vadd.f32 %v1085_v3, %v979_v30  ;;  %v2020_v19 = vpop.f32.mrb[67].mxu1  ;;  %v1821_v3 = vunpack.c.l.bf16 %v1832_v10 }
 0x172   : > { %v2576_v16 = vadd.f32 %v1230_v12, %v1096_v54  ;;  %v2038_v17 = vpop.f32.mrb[67].mxu0 }
 0x176   : > { %v1364_v39 = vpop.f32.mrb[68].mxu1 }
 0x177   : > { %v1235_v20 = vpop.f32.mrb[68].mxu0  ;;  %v1403_v1 = vadd.f32 %v1364_v39, %v1242_v11  ;;  %v2047_v26 = vpop.f32.mrb[69].mxu1 }
 0x178   : > { %v2579_v23 = vadd.f32 %v1235_v20, %v1097_v13  ;;  %v2041_v18 = vpop.f32.mrb[69].mxu0  ;;  %v1367_v29 = vpop.f32.mrb[70].mxu1 }
 0x179   : > { %v1238_v24 = vpop.f32.mrb[70].mxu0  ;;  %v1404_v22 = vadd.f32 %v1367_v29, %v1243_v42  ;;  %v2048_v30 = vpop.f32.mrb[71].mxu1 }
 0x17a   : > { %v2581_v28 = vadd.f32 %v1238_v24, %v1098_v8  ;;  %v2042_v15 = vpop.f32.mrb[71].mxu0 }
 0x17e   : > { %v1372_v36 = vpop.f32.mrb[72].mxu1 }
 0x17f   : > { %v1483_v21 = vpop.f32.mrb[72].mxu0  ;;  %v1405_v38 = vadd.f32 %v1372_v36, %v1244_v25  ;;  %v2051_v32 = vpop.f32.mrb[73].mxu1  ;;  %v1831_v25 = vld [vmem:[%s2586_s22 + $0x8] sm:$0xff]  }
 0x180   : > { %v1522_v34 = vadd.f32 %v1483_v21, %v1403_v1  ;;  %v2069_v11 = vpop.f32.mrb[73].mxu0  ;;  %v1375_v47 = vpop.f32.mrb[74].mxu1  ;;  %v1817_v58 = vunpack.c.l.bf16 %v1831_v25  ;;  %v1818_v46 = vunpack.c.h.bf16 %v1831_v25  ;;  %v1822_v1 = vunpack.c.h.bf16 %v1832_v10  ;;  %v1833_v21 = vld [vmem:[%s2586_s22 + $0x18] sm:$0xff]  }
 0x181   : > { %v1486_v37 = vpop.f32.mrb[74].mxu0  ;;  %v1406_v50 = vadd.f32 %v1375_v47, %v1245_v55  ;;  %v2052_v52 = vpop.f32.mrb[75].mxu1  ;;  %v1826_v47 = vunpack.c.h.bf16 %v1833_v21 }
 0x182   : > { %v1539_v40 = vadd.f32 %v2592_v33, %v1522_v34  ;;  %v1523_v42 = vadd.f32 %v1486_v37, %v1404_v22  ;;  %v2070_v27 = vpop.f32.mrb[75].mxu0  ;;  %v1825_v37 = vunpack.c.l.bf16 %v1833_v21 }
 0x184   : > { %v1569_v48 = vadd.f32 %v1813_v35, %v1539_v40  ;;  %v1540_v51 = vadd.f32 %v2592_v33, %v1523_v42 }
 0x186   : > { %v1579_v53 = vmax.f32 %v1569_v48, 0.0  ;;  %v1570_v44 = vadd.f32 %v1814_v43, %v1540_v51  ;;  %v1380_v59 = vpop.f32.mrb[76].mxu1 }
 0x187   : > { %v1491_v45 = vpop.f32.mrb[76].mxu0  ;;  %v1407_v62 = vadd.f32 %v1380_v59, %v2570_v41  ;;  %v2055_v0 = vpop.f32.mrb[77].mxu1 }
 0x188   : > { %1589 = vst [vmem:[%s2600_s28] sm:$0xff] %v1579_v53  ;;  %v1580_v56 = vmax.f32 %v1570_v44, 0.0  ;;  %v1524_v49 = vadd.f32 %v1491_v45, %v1405_v38  ;;  %v2073_v55 = vpop.f32.mrb[77].mxu0  ;;  %v1383_v60 = vpop.f32.mrb[78].mxu1  ;;  %v1834_v44 = vld [vmem:[%s2586_s22 + $0x20] sm:$0xff]  }
 0x189   : > { %v1494_v61 = vpop.f32.mrb[78].mxu0  ;;  %v1408_v6 = vadd.f32 %v1383_v60, %v2572_v4  ;;  %v2056_v5 = vpop.f32.mrb[79].mxu1  ;;  %v1829_v55 = vunpack.c.l.bf16 %v1834_v44 }
 0x18a   : > { %1590 = vst [vmem:[%s2600_s28 + $0x8] sm:$0xff] %v1580_v56  ;;  %v1541_v63 = vadd.f32 %v2592_v33, %v1524_v49  ;;  %v1525_v57 = vadd.f32 %v1494_v61, %v1406_v50  ;;  %v2074_v2 = vpop.f32.mrb[79].mxu0 }
 0x18c   : > { %v1571_v54 = vadd.f32 %v1817_v58, %v1541_v63  ;;  %v1542_v7 = vadd.f32 %v2592_v33, %v1525_v57 }
 0x18e   : > { %v1581_v12 = vmax.f32 %v1571_v54, 0.0  ;;  %v1572_v13 = vadd.f32 %v1818_v46, %v1542_v7  ;;  %v1388_v19 = vpop.f32.mrb[80].mxu1 }
 0x18f   : > { %v1499_v14 = vpop.f32.mrb[80].mxu0  ;;  %v1409_v18 = vadd.f32 %v1388_v19, %v2574_v9  ;;  %v2059_v39 = vpop.f32.mrb[81].mxu1 }
 0x190   : > { %1591 = vst [vmem:[%s2600_s28 + $0x10] sm:$0xff] %v1581_v12  ;;  %v1582_v41 = vmax.f32 %v1572_v13, 0.0  ;;  %v1526_v17 = vadd.f32 %v1499_v14, %v1407_v62  ;;  %v2077_v8 = vpop.f32.mrb[81].mxu0  ;;  %v1391_v15 = vpop.f32.mrb[82].mxu1 }
 0x191   : > { %v1502_v20 = vpop.f32.mrb[82].mxu0  ;;  %v1410_v22 = vadd.f32 %v1391_v15, %v2576_v16  ;;  %v2060_v31 = vpop.f32.mrb[83].mxu1 }
 0x192   : > { %1592 = vst [vmem:[%s2600_s28 + $0x18] sm:$0xff] %v1582_v41  ;;  %v1543_v4 = vadd.f32 %v2592_v33, %v1526_v17  ;;  %v1527_v24 = vadd.f32 %v1502_v20, %v1408_v6  ;;  %v2078_v26 = vpop.f32.mrb[83].mxu0 }
 0x194   : > { %v1573_v29 = vadd.f32 %v1821_v3, %v1543_v4  ;;  %v1544_v30 = vadd.f32 %v2592_v33, %v1527_v24 }
 0x196   : > { %v1583_v34 = vmax.f32 %v1573_v29, 0.0  ;;  %v1574_v35 = vadd.f32 %v1822_v1, %v1544_v30  ;;  %v1396_v40 = vpop.f32.mrb[84].mxu1 }
 0x197   : > { %v1507_v11 = vpop.f32.mrb[84].mxu0  ;;  %v1411_v42 = vadd.f32 %v1396_v40, %v2579_v23  ;;  %v2063_v43 = vpop.f32.mrb[85].mxu1 }
 0x198   : > { %1593 = vst [vmem:[%s2600_s28 + $0x20] sm:$0xff] %v1583_v34  ;;  %v1584_v9 = vmax.f32 %v1574_v35, 0.0  ;;  %v1528_v36 = vadd.f32 %v1507_v11, %v1409_v18  ;;  %v2081_v38 = vpop.f32.mrb[85].mxu0  ;;  %v1399_v50 = vpop.f32.mrb[86].mxu1 }
 0x199   : > { %v1510_v32 = vpop.f32.mrb[86].mxu0  ;;  %v1412_v52 = vadd.f32 %v1399_v50, %v2581_v28  ;;  %v2064_v53 = vpop.f32.mrb[87].mxu1  ;;  %v1830_v28 = vunpack.c.h.bf16 %v1834_v44 }
 0x19a   : > { %1594 = vst [vmem:[%s2600_s28 + $0x28] sm:$0xff] %v1584_v9  ;;  %v1545_v16 = vadd.f32 %v2592_v33, %v1528_v36  ;;  %v1529_v27 = vadd.f32 %v1510_v32, %v1410_v22  ;;  %v2082_v48 = vpop.f32.mrb[87].mxu0 }
 0x19c   : > { %v1575_v51 = vadd.f32 %v1825_v37, %v1545_v16  ;;  %v1546_v25 = vadd.f32 %v2592_v33, %v1529_v27 }
 0x19e   : > { %v1585_v45 = vmax.f32 %v1575_v51, 0.0  ;;  %v1576_v56 = vadd.f32 %v1826_v47, %v1546_v25 }
 0x19f   : > { %v1515_v49 = vpop.f32.mrb[88].mxu0 }
 0x1a0   : > { %1595 = vst [vmem:[%s2600_s28 + $0x30] sm:$0xff] %v1585_v45  ;;  %v1586_v23 = vmax.f32 %v1576_v56, 0.0  ;;  %v1530_v58 = vadd.f32 %v1515_v49, %v1411_v42  ;;  %v2085_v59 = vpop.f32.mrb[89].mxu0 }
 0x1a1   : > { %v1518_v61 = vpop.f32.mrb[90].mxu0 }
 0x1a2   : > { %1596 = vst [vmem:[%s2600_s28 + $0x38] sm:$0xff] %v1586_v23  ;;  %v1547_v62 = vadd.f32 %v2592_v33, %v1530_v58  ;;  %v1531_v63 = vadd.f32 %v1518_v61, %v1412_v52  ;;  %v2086_v0 = vpop.f32.mrb[91].mxu0 }
 0x1a4   : > { %v1577_v57 = vadd.f32 %v1829_v55, %v1547_v62  ;;  %v1548_v46 = vadd.f32 %v2592_v33, %v1531_v63 }
 0x1a6   : > { %v1587_v2 = vmax.f32 %v1577_v57, 0.0  ;;  %v1578_v60 = vadd.f32 %v1830_v28, %v1548_v46 }
 0x1a8   : > { %1597 = vst [vmem:[%s2600_s28 + $0x40] sm:$0xff] %v1587_v2  ;;  %v1588_v54 = vmax.f32 %v1578_v60, 0.0 }
 0x1aa   : > { %1598 = vst [vmem:[%s2600_s28 + $0x48] sm:$0xff] %v1588_v54 }
 0x1ab PF: > { %s14_s17 = sadd.s32 1, %s2163_s17   ;;  %s2644_s15 = smov %s2159_s16 }
 0x1ac   : > { %p11_p5 = scmp.ge.s32.totalorder %s14_s17, 4   ;;  %s2645_s16 = smov %s2647_s18 }
 0x1ae   :  { %13 = sbr.rel (!%p11_p5) target bundleno = 2 (0x2), region = 83 }

// kernel: residual_block_forward.2
= control target key start
LH: loop header
LB: loop body
LE: loop exit
PB: predicated region body
PF: predicated region fallthrough
CT: control target
= control target key end

     0   :  { %s2829_s21 = smov 0   ;;  %s2831_s22 = smov 0   ;;  %s3353_s0 = inlined_call_operand.vmem [shape: bf16[2,4,96,4], index: 0, kind: input, shape index: {}]   ;;  %s3354_s1 = inlined_call_operand.vmem [shape: bf16[3,3,4,128], index: 1, kind: input, shape index: {}]   ;;  %s3355_s2 = inlined_call_operand.vmem [shape: f32[1,128], index: 2, kind: input, shape index: {}]   ;;  %s3356_s3 = inlined_call_operand.vmem [shape: bf16[4,128], index: 3, kind: input, shape index: {}]   ;;  %s3357_s4 = inlined_call_operand.vmem [shape: f32[1,128], index: 4, kind: input, shape index: {}]   ;;  %s3358_s5 = inlined_call_operand.vmem [shape: bf16[2,80,128], index: 5, kind: output, shape index: {0}]   ;;  %s3359_s6 = inlined_call_operand.vmem [shape: bf16[2,80,128], index: 6, kind: output, shape index: {1}]  }
   0x1   :  { %s2833_s23 = smov 0  }
   0x2 LB: > { %s29_s24 = sadd.s32 1, %s2786_s22  ;;  %p2154_p0 = scmp.ge.s32.totalorder %s2790_s23, 1  ;;  %s2790_s23 = sphi %s2833_s23, %s17_s23   ;;  %s2786_s22 = sphi %s2831_s22, %s3361_s22   ;;  %s2782_s21 = sphi %s2829_s21, %s3360_s21  }
   0x3   : > { %p31_p1 = scmp.ge.s32.totalorder %s29_s24, 2  ;;  %p265_p2 = scmp.lt.s32.totalorder %s2790_s23, 3 }
   0x5   : > { %s3363_s24 = smov (%p31_p1, %s29_s24), 0  ;;  %p266_p3 = pnand %p2154_p0, %p265_p2 }
   0x6   : > { %v2168_v0 = vld [vmem:[%s3354_s1 + $0x2] sm:$0x3] (!%p266_p3)  ;;  %vm421_vm0 = vcmask (!%p266_p3), 1041408   ;;  %v366_v1 = vld [vmem:[%s3354_s1] sm:$0x3] (!%p266_p3)  ;;  %v2792_v2 = vmov (!%p266_p3), 0.0  }
   0x7   : > { %269 = sbr.rel (%p266_p3) target bundleno = 436 (0x1b4), region = 40  ;;  %2475 = vmatprep.subr.bf16.mxu0 (!%p266_p3), %v2792_v2  ;;  %v423_v3 = vsel (!%p266_p3), %vm421_vm0, %v2168_v0, 0  ;;  %2497 = vmatprep.subr.bf16.mxu1 (!%p266_p3), %v2792_v2  ;;  %v539_v4 = vsel (!%p266_p3), %vm421_vm0, %v366_v1, 0  ;;  %p320_p4 = scmp.lt.s32.totalorder (!%p266_p3), %s2782_s21, 1  ;;  %vm2793_vm1 = vmmov (!%p266_p3), 0   ;;  %vm405_vm2 = vcmask (!%p266_p3), 31744  }
   0x8   : > { %2476 = vmatpush3.bf16.msra.mxu0 (!%p266_p3), %v423_v3  ;;  %2498 = vmatpush3.bf16.msra.mxu1 (!%p266_p3), %v539_v4  ;;  %v2189_v5 = vld [vmem:[%s3354_s1 + $0x4] sm:$0x3] (!%p266_p3)  ;;  %v2211_v6 = vld [vmem:[%s3354_s1 + $0x6] sm:$0x3] (!%p266_p3)  ;;  %v2232_v18 = vld [vmem:[%s3354_s1 + $0x8] sm:$0x3] (!%p266_p3) }
   0x9   : > { %2477 = vmatprep.mubr.msk.bf16.mxu0 (!%p266_p3), %vm2793_vm1, %v2792_v2  ;;  %2499 = vmatprep.mubr.msk.bf16.mxu1 (!%p266_p3), %vm2793_vm1, %v2792_v2  ;;  %v716_v8 = vsel (!%p266_p3), %vm421_vm0, %v2189_v5, 0  ;;  %v855_v10 = vsel (!%p266_p3), %vm421_vm0, %v2211_v6, 0  ;;  %v1079_v19 = vld [vmem:[%s3356_s3] sm:$0x3] (!%p266_p3)  ;;  %vm655_vm3 = vsmask.f32 (!%p266_p3), 7424 }
   0xa   : > { %2519 = vmatprep.subr.bf16.mxu0 (!%p266_p3), %v2792_v2  ;;  %2541 = vmatprep.subr.bf16.mxu1 (!%p266_p3), %v2792_v2  ;;  %v2924_v27 = vsel (!%p266_p3), %vm421_vm0, %v2232_v18, 0  ;;  %v2927_v28 = vsel (!%p266_p3), %vm421_vm0, %v1079_v19, 0  ;;  %vm1777_vm4 = vcmask (!%p266_p3), 1046528  }
   0xe   : > { %s3365_s21 = smov (!%p320_p4, %s2782_s21), 1 }
   0xf   : > { %s2695_s29 = smul.u32 192, %s3365_s21 }
  0x10   : > { %s2696_s7 = smul.u32 40, %s3365_s21 }
  0x11   : > { %s2875_s12 = scalar_lea.vmem %s3353_s0, %s2695_s29 }
  0x12   : > { %v2723_v7 = vld [vmem:[%s2875_s12 + $0x30] sm:$0xff]   ;;  %v2724_v9 = vld [vmem:[%s2875_s12] sm:$0xff]   ;;  %v2725_v11 = vld [vmem:[%s2875_s12 + $0x38] sm:$0xff]   ;;  %s3256_s10 = scalar_lea.vmem %s3359_s6, %s2696_s7  ;;  %s3322_s15 = scalar_lea.vmem %s3358_s5, %s2696_s7 }
  0x13   : > { %2478 = vmatmul.mubr.msk.bf16.vlgmr.msra.gmra.mrb[0].mxu0 %vm405_vm2, %v2723_v7  ;;  %2500 = vmatmul.mubr.msk.bf16.vlgmr.msra.gmra.mrb[0].mxu1 %vm405_vm2, %v2724_v9  ;;  %v2726_v12 = vld [vmem:[%s2875_s12 + $0x8] sm:$0xff]   ;;  %v2727_v13 = vld [vmem:[%s2875_s12 + $0x40] sm:$0xff]   ;;  %v2728_v14 = vld [vmem:[%s2875_s12 + $0x10] sm:$0xff]  }
  0x14   : > { %2520 = vmatpush3.bf16.msra.mxu0 %v716_v8  ;;  %2542 = vmatpush3.bf16.msra.mxu1 %v855_v10  ;;  %v2733_v15 = vld [vmem:[%s2875_s12] sm:$0xff]   ;;  %v2905_v16 = vld [vmem:[%s2875_s12 + $0x8] sm:$0xff]   ;;  %v2916_v20 = vld [vmem:[%s2875_s12 + $0x10] sm:$0xff]  }
  0x15   : > { %2481 = vmatprep.mubr.msk.bf16.mxu0 %vm2793_vm1, %v2792_v2  ;;  %2503 = vmatprep.mubr.msk.bf16.mxu1 %vm2793_vm1, %v2792_v2  ;;  %v659_v17 = vshll.u32 %v2733_v15, 16  ;;  %v2729_v21 = vld [vmem:[%s2875_s12 + $0x48] sm:$0xff]   ;;  %v2730_v22 = vld [vmem:[%s2875_s12 + $0x18] sm:$0xff]   ;;  %v664_v23 = vshll.u32 %v2905_v16, 16  ;;  %v657_v24 = vshrl.u32 %v2733_v15, 16  ;;  %v672_v26 = vshll.u32 %v2916_v20, 16 }
  0x16   : > { %2563 = vmatprep.subr.bf16.mxu0 %v2792_v2  ;;  %2585 = vmatprep.subr.bf16.mxu1 %v2792_v2  ;;  %v668_v30 = vshrl.u32 %v2905_v16, 16  ;;  %v2731_v31 = vld [vmem:[%s2875_s12 + $0x50] sm:$0xff]   ;;  %v676_v32 = vshrl.u32 %v2916_v20, 16  ;;  %v2749_v33 = vld [vmem:[%s2875_s12 + $0x60] sm:$0xff]   ;;  %v2750_v37 = vld [vmem:[%s2875_s12 + $0x68] sm:$0xff]  }
  0x17   : > { %v661_v25 = vrot.slane %v659_v17, 1  ;;  %v2932_v29 = vrot.slane %v664_v23, 1  ;;  %v2732_v34 = vld [vmem:[%s2875_s12 + $0x20] sm:$0xff]   ;;  %v2941_v36 = vrot.slane %v672_v26, 1  ;;  %v2946_v39 = vld [vmem:[%s2875_s12 + $0x8] sm:$0xf] }
  0x18   : > { %v1399_v38 = vld [vmem:[%s2875_s12 + $0x4] sm:$0xf]  ;;  %v1255_v40 = vshrl.u32 %v2749_v33, 16  ;;  %v1257_v41 = vshll.u32 %v2749_v33, 16  ;;  %v1262_v43 = vshll.u32 %v2750_v37, 16  ;;  %v2950_v44 = vld [vmem:[%s2875_s12 + $0xc] sm:$0xff]  }
  0x19   : > { %v662_v35 = vor.u32 %v661_v25, %v657_v24  ;;  %v2283_v42 = vcombine.low %v1399_v38, %v2946_v39  ;;  %v2753_v48 = vld [vmem:[%s2875_s12 + $0x70] sm:$0xff]   ;;  %v1266_v49 = vshrl.u32 %v2750_v37, 16  ;;  %v1448_v53 = vshll.u32 %v2950_v44, 16  ;;  %v2755_v58 = vld [vmem:[%s2875_s12 + $0x78] sm:$0xff]   ;;  %v2735_v5 = vld [vmem:[%s2875_s12 + $0x60] sm:$0xff]  }
  0x1a   : > { %v1259_v45 = vrot.slane %v1257_v41, 1  ;;  %v2954_v50 = vld [vmem:[%s2875_s12 + $0x14] sm:$0xff]   ;;  %v1264_v52 = vrot.slane %v1262_v43, 1  ;;  %v1270_v56 = vshll.u32 %v2753_v48, 16  ;;  %v1452_v57 = vshrl.u32 %v2950_v44, 16  ;;  %v2967_v63 = vld [vmem:[%s2875_s12 + $0x1c] sm:$0xff]  }
  0x1b   : > { %2482 = vmatmul.mubr.msk.bf16.gmra.mrb[4].mxu0 %vm405_vm2, %v2725_v11  ;;  %2504 = vmatmul.mubr.msk.bf16.gmra.mrb[4].mxu1 %vm405_vm2, %v2726_v12  ;;  %v1441_v46 = vshrl.u32 %v2283_v42, 16  ;;  %v1443_v47 = vshll.u32 %v2283_v42, 16  ;;  %v667_v51 = vsel %vm655_vm3, %v662_v35, %v2932_v29  ;;  %v1450_v59 = vrot.slane %v1448_v53, 1  ;;  %v2757_v10 = vld [vmem:[%s2875_s12 + $0x80] sm:$0xff]   ;;  %v2761_v43 = vld [vmem:[%s2875_s12 + $0x34] sm:$0xff]  }
  0x1c   : > { %2485 = vmatprep.mubr.msk.bf16.mxu0 %vm2793_vm1, %v2792_v2  ;;  %2507 = vmatprep.mubr.msk.bf16.mxu1 %vm2793_vm1, %v2792_v2  ;;  %v1260_v54 = vor.u32 %v1259_v45, %v1255_v40  ;;  %v1268_v60 = vor.u32 %v1266_v49, %v1264_v52  ;;  %v1456_v61 = vshll.u32 %v2954_v50, 16  ;;  %v1274_v62 = vshrl.u32 %v2753_v48, 16  ;;  %v2985_v15 = vld [vmem:[%s2875_s12 + $0x24] sm:$0xff]   ;;  %v3003_v37 = vld [vmem:[%s2875_s12 + $0x2c] ss:$0 sps:$4 sm:$0x11]  }
  0x1d   : > { %v1445_v55 = vrot.slane %v1443_v47, 1  ;;  %v1272_v3 = vrot.slane %v1270_v56, 1  ;;  %v1278_v4 = vshll.u32 %v2755_v58, 16  ;;  %v1454_v6 = vor.u32 %v1452_v57, %v1450_v59  ;;  %v2764_v53 = vld [vmem:[%s2875_s12 + $0x44] sm:$0xff]  }
  0x1e   : > { %v2972_v0 = vsel %vm655_vm3, %v1260_v54, %v1264_v52  ;;  %v1458_v7 = vrot.slane %v1456_v61, 1  ;;  %v1460_v8 = vshrl.u32 %v2954_v50, 16  ;;  %v1464_v9 = vshll.u32 %v2967_v63, 16 }
  0x1f   : > { %v1446_v1 = vor.u32 %v1445_v55, %v1441_v46  ;;  %v2982_v12 = vsel %vm655_vm3, %v1268_v60, %v1272_v3  ;;  %v1286_v24 = vshll.u32 %v2757_v10, 16  ;;  %v1468_v25 = vshrl.u32 %v2967_v63, 16 }
  0x20   : > { %v2988_v17 = vsel %vm655_vm3, %v1454_v6, %v1458_v7  ;;  %v1462_v18 = vor.u32 %v1460_v8, %v1458_v7  ;;  %v1466_v19 = vrot.slane %v1464_v9, 1  ;;  %v1472_v26 = vshll.u32 %v2985_v15, 16 }
  0x21   : > { %v2979_v11 = vsel %vm655_vm3, %v1446_v1, %v1450_v59  ;;  %v1290_v35 = vshrl.u32 %v2757_v10, 16  ;;  %v1288_v38 = vrot.slane %v1286_v24, 1  ;;  %v670_v45 = vor.u32 %v668_v30, %v2932_v29  ;;  %v2762_v29 = vld [vmem:[%s2875_s12 + $0x3c] sm:$0xff]   ;;  %v2766_v24 = vld [vmem:[%s2875_s12 + $0x54] sm:$0xff]  }
  0x22   : > { %v3000_v33 = vsel %vm655_vm3, %v1462_v18, %v1466_v19  ;;  %v1470_v40 = vor.u32 %v1468_v25, %v1466_v19  ;;  %v1474_v41 = vrot.slane %v1472_v26, 1  ;;  %v1476_v46 = vshrl.u32 %v2985_v15, 16 }
  0x23   : > { %2486 = vmatmul.mubr.msk.bf16.gmra.mrb[8].mxu0 %vm405_vm2, %v2727_v13  ;;  %2508 = vmatmul.mubr.msk.bf16.gmra.mrb[8].mxu1 %vm405_vm2, %v2728_v14  ;;  %v1276_v13 = vor.u32 %v1274_v62, %v1272_v3  ;;  %v1280_v14 = vrot.slane %v1278_v4, 1  ;;  %v1480_v47 = vshll.u32 %v3003_v37, 16  ;;  %v1629_v52 = vshll.u32 %v2761_v43, 16  ;;  %v2765_v62 = vld [vmem:[%s2875_s12 + $0x4c] sm:$0xff]  }
  0x24   : > { %2489 = vmatprep.mubr.msk.bf16.mxu0 %vm2793_vm1, %v2792_v2  ;;  %2511 = vmatprep.mubr.msk.bf16.mxu1 %vm2793_vm1, %v2792_v2  ;;  %v3021_v49 = vsel %vm655_vm3, %v1470_v40, %v1474_v41  ;;  %v1634_v56 = vshll.u32 %v2762_v29, 16  ;;  %v675_v57 = vsel %vm655_vm3, %v670_v45, %v2941_v36  ;;  %v1638_v61 = vshrl.u32 %v2762_v29, 16 }
  0x25   : > { %v2994_v23 = vsel %vm655_vm3, %v1276_v13, %v1280_v14  ;;  %v1482_v30 = vrot.slane %v1480_v47, 1  ;;  %v1631_v60 = vrot.slane %v1629_v52, 1  ;;  %v1642_v3 = vshll.u32 %v2764_v53, 16  ;;  %v2740_v13 = vld [vmem:[%s2875_s12 + $0x20] sm:$0xff]  }
  0x26   : > { %v1636_v1 = vrot.slane %v1634_v56, 1  ;;  %v1650_v6 = vshll.u32 %v2765_v62, 16  ;;  %v678_v9 = vor.u32 %v676_v32, %v2941_v36  ;;  %v1654_v25 = vshrl.u32 %v2765_v62, 16  ;;  %v2743_v56 = vld [vmem:[%s2875_s12 + $0x80] sm:$0xff]  }
  0x27   : > { %v1644_v8 = vrot.slane %v1642_v3, 1  ;;  %v1658_v32 = vshll.u32 %v2766_v24, 16  ;;  %v1662_v45 = vshrl.u32 %v2766_v24, 16  ;;  %v692_v29 = vshrl.u32 %v2740_v13, 16  ;;  %v2746_v3 = vld [vmem:[%s2875_s12 + $0xa0] sm:$0xff]  }
  0x28   : > { %v1640_v7 = vor.u32 %v1638_v61, %v1636_v1  ;;  %v1652_v18 = vrot.slane %v1650_v6, 1  ;;  %v2305_v6 = vld [vmem:[%s3354_s1 + $0xe] sm:$0x3] }
  0x2a   : > { %v3054_v19 = vsel %vm655_vm3, %v1640_v7, %v1644_v8  ;;  %v1656_v20 = vor.u32 %v1654_v25, %v1652_v18  ;;  %v2317_v7 = vld [vmem:[%s3354_s1 + $0x10] sm:$0x3] }
  0x2b   : > { %2490 = vmatmul.mubr.msk.bf16.gmra.mrb[12].mxu0 %vm405_vm2, %v2729_v21  ;;  %2512 = vmatmul.mubr.msk.bf16.gmra.mrb[12].mxu1 %vm405_vm2, %v2730_v22  ;;  %v1282_v21 = vshrl.u32 %v2755_v58, 16  ;;  %v2991_v22 = vld [vmem:[%s2875_s12 + $0x18] sm:$0xff]   ;;  %v2737_v58 = vld [vmem:[%s2875_s12 + $0x68] sm:$0xff]  }
  0x2c   : > { %2493 = vmatprep.mubr.msk.bf16.mxu0 %vm2793_vm1, %v2792_v2  ;;  %2515 = vmatprep.mubr.msk.bf16.mxu1 %vm2793_vm1, %v2792_v2  ;;  %v680_v54 = vshll.u32 %v2991_v22, 16 }
  0x2e   : > { %v682_v10 = vrot.slane %v680_v54, 1 }
  0x30   : > { %v683_v36 = vsel %vm655_vm3, %v678_v9, %v682_v10  ;;  %v1805_v9 = vsel %vm421_vm0, %v2317_v7, 0 }
  0x33   : > { %2494 = vmatmul.mubr.msk.bf16.gmra.mrb[16].mxu0 %vm405_vm2, %v2731_v31  ;;  %2516 = vmatmul.mubr.msk.bf16.gmra.mrb[16].mxu1 %vm405_vm2, %v2732_v34  ;;  %v2759_v31 = vld [vmem:[%s2875_s12 + $0x88] ss:$0 sps:$4 sm:$0x11]   ;;  %v1284_v34 = vor.u32 %v1282_v21, %v1280_v14 }
  0x34   : > { %2521 = vmatprep.mubr.msk.bf16.mxu0 %vm2793_vm1, %v2792_v2  ;;  %2543 = vmatprep.mubr.msk.bf16.mxu1 %vm2793_vm1, %v2792_v2  ;;  %v1294_v42 = vshll.u32 %v2759_v31, 16  ;;  %v2739_v31 = vld [vmem:[%s2875_s12 + $0x70] sm:$0xff]  }
  0x35   : > { %v3018_v48 = vsel %vm655_vm3, %v1284_v34, %v1288_v38  ;;  %v684_v34 = vshrl.u32 %v2991_v22, 16  ;;  %v2767_v22 = vld [vmem:[%s2875_s12 + $0x5c] ss:$0 sps:$4 sm:$0x11]  }
  0x36   : > { %v1296_v16 = vrot.slane %v1294_v42, 1  ;;  %v1666_v47 = vshll.u32 %v2767_v22, 16 }
  0x3b   : > { %2522 = vmatmul.mubr.msk.bf16.vlgmr.msra.gmra.mrb[20].mxu0 %vm405_vm2, %v667_v51  ;;  %2544 = vmatmul.mubr.msk.bf16.vlgmr.msra.gmra.mrb[20].mxu1 %vm405_vm2, %v2735_v5  ;;  %v1627_v51 = vshrl.u32 %v2761_v43, 16  ;;  %v1646_v5 = vshrl.u32 %v2764_v53, 16  ;;  %v2742_v43 = vld [vmem:[%s2875_s12 + $0x28] ss:$0 sps:$4 sm:$0x11]  }
  0x3c   : > { %2564 = vmatpush3.bf16.msra.mxu0 %v2924_v27  ;;  %2586 = vmatpush3.bf16.msra.mxu1 %v2927_v28  ;;  %v1292_v27 = vor.u32 %v1290_v35, %v1288_v38  ;;  %v1478_v28 = vor.u32 %v1476_v46, %v1474_v41  ;;  %v688_v35 = vshll.u32 %v2740_v13, 16  ;;  %v1660_v38 = vrot.slane %v1658_v32, 1 }
  0x3d   : > { %2525 = vmatprep.mubr.msk.bf16.mxu0 %vm2793_vm1, %v2792_v2  ;;  %2547 = vmatprep.mubr.msk.bf16.mxu1 %vm2793_vm1, %v2792_v2  ;;  %v1632_v4 = vor.u32 %v1631_v60, %v1627_v51  ;;  %v1648_v21 = vor.u32 %v1646_v5, %v1644_v8  ;;  %v686_v41 = vor.u32 %v684_v34, %v682_v10  ;;  %v2282_v60 = vld [vmem:[%s3354_s1 + $0xc] sm:$0x3]  ;;  %v2748_v5 = vld [vmem:[%s2875_s12 + $0xb0] sm:$0xff]   ;;  %v1686_v8 = vsel %vm421_vm0, %v2305_v6, 0 }
  0x3e   : > { %2607 = vmatprep.subr.bf16.mxu0 %v2792_v2  ;;  %2629 = vmatprep.subr.bf16.mxu1 %v2792_v2  ;;  %v3031_v55 = vsel %vm655_vm3, %v1292_v27, %v1296_v16  ;;  %v3037_v59 = vsel %vm655_vm3, %v1478_v28, %v1482_v30  ;;  %v3065_v40 = vsel %vm655_vm3, %v1656_v20, %v1660_v38  ;;  %v690_v42 = vrot.slane %v688_v35, 1  ;;  %v2741_v16 = vld [vmem:[%s2875_s12 + $0x78] sm:$0xff]  }
  0x3f   : > { %v3049_v14 = vsel %vm655_vm3, %v1632_v4, %v1636_v1  ;;  %v3058_v26 = vsel %vm655_vm3, %v1648_v21, %v1652_v18  ;;  %v1664_v46 = vor.u32 %v1662_v45, %v1660_v38  ;;  %v696_v28 = vshll.u32 %v2742_v43, 16  ;;  %v2745_v1 = vld [vmem:[%s2875_s12 + $0x98] sm:$0xff]   ;;  %v2747_v4 = vld [vmem:[%s2875_s12 + $0xa8] sm:$0xff]  }
  0x40   : > { %v691_v27 = vsel %vm655_vm3, %v686_v41, %v690_v42  ;;  %v1668_v30 = vrot.slane %v1666_v47, 1  ;;  %v694_v52 = vor.u32 %v692_v29, %v690_v42  ;;  %v1500_v62 = vsel %vm421_vm0, %v2282_v60, 0 }
  0x41   : > { %v698_v53 = vrot.slane %v696_v28, 1 }
  0x42   : > { %v3078_v51 = vsel %vm655_vm3, %v1664_v46, %v1668_v30 }
  0x43   : > { %2526 = vmatmul.mubr.msk.bf16.gmra.mrb[24].mxu0 %vm405_vm2, %v675_v57  ;;  %2548 = vmatmul.mubr.msk.bf16.gmra.mrb[24].mxu1 %vm405_vm2, %v2737_v58  ;;  %v699_v54 = vsel %vm655_vm3, %v694_v52, %v698_v53  ;;  %v2270_v57 = vld [vmem:[%s3354_s1 + $0xa] sm:$0x3]  ;;  %v2744_v58 = vld [vmem:[%s2875_s12 + $0x90] sm:$0xff]  }
  0x44   : > { %2529 = vmatprep.mubr.msk.bf16.mxu0 %vm2793_vm1, %v2792_v2  ;;  %2551 = vmatprep.mubr.msk.bf16.mxu1 %vm2793_vm1, %v2792_v2  ;;  %v1314_v61 = vsel %vm421_vm0, %v2270_v57, 0 }
  0x4b   : > { %2530 = vmatmul.mubr.msk.bf16.gmra.mrb[28].mxu0 %vm405_vm2, %v683_v36  ;;  %2552 = vmatmul.mubr.msk.bf16.gmra.mrb[28].mxu1 %vm405_vm2, %v2739_v31 }
  0x4c   : > { %2533 = vmatprep.mubr.msk.bf16.mxu0 %vm2793_vm1, %v2792_v2  ;;  %2555 = vmatprep.mubr.msk.bf16.mxu1 %vm2793_vm1, %v2792_v2 }
  0x53   : > { %2534 = vmatmul.mubr.msk.bf16.gmra.mrb[32].mxu0 %vm405_vm2, %v691_v27  ;;  %2556 = vmatmul.mubr.msk.bf16.gmra.mrb[32].mxu1 %vm405_vm2, %v2741_v16 }
  0x54   : > { %2537 = vmatprep.mubr.msk.bf16.mxu0 %vm2793_vm1, %v2792_v2  ;;  %2559 = vmatprep.mubr.msk.bf16.mxu1 %vm2793_vm1, %v2792_v2 }
  0x5b   : > { %2538 = vmatmul.mubr.msk.bf16.gmra.mrb[36].mxu0 %vm405_vm2, %v699_v54  ;;  %2560 = vmatmul.mubr.msk.bf16.gmra.mrb[36].mxu1 %vm405_vm2, %v2743_v56 }
  0x5c   : > { %2565 = vmatprep.mubr.msk.bf16.mxu0 %vm2793_vm1, %v2792_v2  ;;  %2587 = vmatprep.mubr.msk.bf16.mxu1 %vm2793_vm1, %v2792_v2 }
  0x63   : > { %2566 = vmatmul.mubr.msk.bf16.vlgmr.msra.gmra.mrb[40].mxu0 %vm405_vm2, %v2744_v58  ;;  %2588 = vmatmul.mubr.msk.bf16.vlgmr.msra.gmra.mrb[40].mxu1 %vm405_vm2, %v2744_v58 }
  0x64   : > { %2608 = vmatpush3.bf16.msra.mxu0 %v1314_v61  ;;  %2630 = vmatpush3.bf16.msra.mxu1 %v1500_v62 }
  0x65   : > { %2569 = vmatprep.mubr.msk.bf16.mxu0 %vm2793_vm1, %v2792_v2  ;;  %2591 = vmatprep.mubr.msk.bf16.mxu1 %vm2793_vm1, %v2792_v2 }
  0x66   : > { %2651 = vmatprep.subr.bf16.mxu0 %v2792_v2  ;;  %2673 = vmatprep.subr.bf16.mxu1 %v2792_v2 }
  0x6b   : > { %2570 = vmatmul.mubr.msk.bf16.gmra.mrb[44].mxu0 %vm405_vm2, %v2745_v1  ;;  %2592 = vmatmul.mubr.msk.bf16.gmra.mrb[44].mxu1 %vm405_vm2, %v2745_v1 }
  0x6c   : > { %2573 = vmatprep.mubr.msk.bf16.mxu0 %vm2793_vm1, %v2792_v2  ;;  %2595 = vmatprep.mubr.msk.bf16.mxu1 %vm2793_vm1, %v2792_v2 }
  0x73   : > { %2574 = vmatmul.mubr.msk.bf16.gmra.mrb[48].mxu0 %vm405_vm2, %v2746_v3  ;;  %2596 = vmatmul.mubr.msk.bf16.gmra.mrb[48].mxu1 %vm405_vm2, %v2746_v3 }
  0x74   : > { %2577 = vmatprep.mubr.msk.bf16.mxu0 %vm2793_vm1, %v2792_v2  ;;  %2599 = vmatprep.mubr.msk.bf16.mxu1 %vm2793_vm1, %v2792_v2 }
  0x7b   : > { %2578 = vmatmul.mubr.msk.bf16.gmra.mrb[52].mxu0 %vm405_vm2, %v2747_v4  ;;  %2600 = vmatmul.mubr.msk.bf16.gmra.mrb[52].mxu1 %vm405_vm2, %v2747_v4 }
  0x7c   : > { %2581 = vmatprep.mubr.msk.bf16.mxu0 %vm2793_vm1, %v2792_v2  ;;  %2603 = vmatprep.mubr.msk.bf16.mxu1 %vm2793_vm1, %v2792_v2 }
  0x83   : > { %2582 = vmatmul.mubr.msk.bf16.gmra.mrb[56].mxu0 %vm405_vm2, %v2748_v5  ;;  %2604 = vmatmul.mubr.msk.bf16.gmra.mrb[56].mxu1 %vm405_vm2, %v2748_v5 }
  0x84   : > { %2609 = vmatprep.mubr.msk.bf16.mxu0 %vm2793_vm1, %v2792_v2  ;;  %2631 = vmatprep.mubr.msk.bf16.mxu1 %vm2793_vm1, %v2792_v2 }
  0x8b   : > { %2610 = vmatmul.mubr.msk.bf16.vlgmr.msra.gmra.mrb[60].mxu0 %vm405_vm2, %v2972_v0  ;;  %2632 = vmatmul.mubr.msk.bf16.vlgmr.msra.gmra.mrb[60].mxu1 %vm405_vm2, %v2979_v11  ;;  %v1771_v0 = vld [vmem:[%s2875_s12 + $0x4] sm:$0xe] }
  0x8c   : > { %2652 = vmatpush3.bf16.msra.mxu0 %v1686_v8  ;;  %2674 = vmatpush3.bf16.msra.mxu1 %v1805_v9  ;;  %v2318_v11 = vcombine.low %v1771_v0, %v2946_v39  ;;  %v1781_v39 = vrot.slane %v2954_v50, 1  ;;  %v1785_v50 = vrot.slane %v2985_v15, 1 }
  0x8d   : > { %2613 = vmatprep.mubr.msk.bf16.mxu0 %vm2793_vm1, %v2792_v2  ;;  %2635 = vmatprep.mubr.msk.bf16.mxu1 %vm2793_vm1, %v2792_v2 }
  0x93   : > { %2614 = vmatmul.mubr.msk.bf16.gmra.mrb[64].mxu0 %vm405_vm2, %v2982_v12  ;;  %2636 = vmatmul.mubr.msk.bf16.gmra.mrb[64].mxu1 %vm405_vm2, %v2988_v17  ;;  %v1778_v12 = vrot.slane %v2318_v11, 1  ;;  %v1779_v17 = vrot.slane %v2950_v44, 1  ;;  %v1783_v44 = vrot.slane %v2967_v63, 1  ;;  %v1787_v63 = vrot.slane %v3003_v37, 1 }
  0x94   : > { %2617 = vmatprep.mubr.msk.bf16.mxu0 %vm2793_vm1, %v2792_v2  ;;  %2639 = vmatprep.mubr.msk.bf16.mxu1 %vm2793_vm1, %v2792_v2 }
  0x9b   : > { %2618 = vmatmul.mubr.msk.bf16.gmra.mrb[68].mxu0 %vm405_vm2, %v2994_v23  ;;  %2640 = vmatmul.mubr.msk.bf16.gmra.mrb[68].mxu1 %vm405_vm2, %v3000_v33  ;;  %v1780_v23 = vsel %vm1777_vm4, %v1778_v12, %v1779_v17  ;;  %v1782_v33 = vsel %vm1777_vm4, %v1779_v17, %v1781_v39 }
  0x9c   : > { %2621 = vmatprep.mubr.msk.bf16.mxu0 %vm2793_vm1, %v2792_v2  ;;  %2643 = vmatprep.mubr.msk.bf16.mxu1 %vm2793_vm1, %v2792_v2 }
  0xa3   : > { %2622 = vmatmul.mubr.msk.bf16.gmra.mrb[72].mxu0 %vm405_vm2, %v3018_v48  ;;  %2644 = vmatmul.mubr.msk.bf16.gmra.mrb[72].mxu1 %vm405_vm2, %v3021_v49  ;;  %v1784_v48 = vsel %vm1777_vm4, %v1781_v39, %v1783_v44  ;;  %v1786_v49 = vsel %vm1777_vm4, %v1783_v44, %v1785_v50 }
  0xa4   : > { %2625 = vmatprep.mubr.msk.bf16.mxu0 %vm2793_vm1, %v2792_v2  ;;  %2647 = vmatprep.mubr.msk.bf16.mxu1 %vm2793_vm1, %v2792_v2 }
  0xab   : > { %2626 = vmatmul.mubr.msk.bf16.gmra.mrb[76].mxu0 %vm405_vm2, %v3031_v55  ;;  %2648 = vmatmul.mubr.msk.bf16.gmra.mrb[76].mxu1 %vm405_vm2, %v3037_v59  ;;  %v1788_v55 = vsel %vm1777_vm4, %v1785_v50, %v1787_v63 }
  0xac   : > { %2653 = vmatprep.mubr.msk.bf16.mxu0 %vm2793_vm1, %v2792_v2  ;;  %2675 = vmatprep.mubr.msk.bf16.mxu1 %vm2793_vm1, %v2792_v2 }
  0xb3   : > { %2654 = vmatmul.mubr.msk.bf16.vlgmr.msra.gmra.mrb[80].mxu0 %vm405_vm2, %v3049_v14  ;;  %2676 = vmatmul.mubr.msk.bf16.vlgmr.msra.gmra.mrb[80].mxu1 %vm405_vm2, %v1780_v23 }
  0xb4   : > { %2657 = vmatprep.mubr.msk.bf16.mxu0 %vm2793_vm1, %v2792_v2  ;;  %2679 = vmatprep.mubr.msk.bf16.mxu1 %vm2793_vm1, %v2792_v2 }
  0xbb   : > { %2658 = vmatmul.mubr.msk.bf16.gmra.mrb[84].mxu0 %vm405_vm2, %v3054_v19  ;;  %2680 = vmatmul.mubr.msk.bf16.gmra.mrb[84].mxu1 %vm405_vm2, %v1782_v33 }
  0xbc   : > { %2661 = vmatprep.mubr.msk.bf16.mxu0 %vm2793_vm1, %v2792_v2  ;;  %2683 = vmatprep.mubr.msk.bf16.mxu1 %vm2793_vm1, %v2792_v2 }
  0xc3   : > { %2662 = vmatmul.mubr.msk.bf16.gmra.mrb[88].mxu0 %vm405_vm2, %v3058_v26  ;;  %2684 = vmatmul.mubr.msk.bf16.gmra.mrb[88].mxu1 %vm405_vm2, %v1784_v48 }
  0xc4   : > { %2665 = vmatprep.mubr.msk.bf16.mxu0 %vm2793_vm1, %v2792_v2  ;;  %2687 = vmatprep.mubr.msk.bf16.mxu1 %vm2793_vm1, %v2792_v2 }
  0xcb   : > { %2666 = vmatmul.mubr.msk.bf16.gmra.mrb[92].mxu0 %vm405_vm2, %v3065_v40  ;;  %2688 = vmatmul.mubr.msk.bf16.gmra.mrb[92].mxu1 %vm405_vm2, %v1786_v49 }
  0xcc   : > { %2669 = vmatprep.mubr.msk.bf16.mxu0 %vm2793_vm1, %v2792_v2  ;;  %2691 = vmatprep.mubr.msk.bf16.mxu1 %vm2793_vm1, %v2792_v2 }
  0xd3   : > { %2670 = vmatmul.mubr.msk.bf16.gmra.mrb[96].mxu0 %vm405_vm2, %v3078_v51  ;;  %2692 = vmatmul.mubr.msk.bf16.gmra.mrb[96].mxu1 %vm405_vm2, %v1788_v55 }
  0xe6   : > { %v459_v15 = vpop.f32.mrb[0].mxu0  ;;  %v575_v59 = vpop.f32.mrb[0].mxu1 }
  0xe7   : > { %v2479_v10 = vpop.f32.mrb[1].mxu0  ;;  %v576_v13 = vadd.f32 %v575_v59, %v459_v15  ;;  %v2501_v14 = vpop.f32.mrb[1].mxu1 }
  0xe8   : > { %v462_v18 = vpop.f32.mrb[2].mxu0  ;;  %v578_v19 = vpop.f32.mrb[2].mxu1 }
  0xe9   : > { %v2480_v21 = vpop.f32.mrb[3].mxu0  ;;  %v579_v24 = vadd.f32 %v578_v19, %v462_v18  ;;  %v2502_v25 = vpop.f32.mrb[3].mxu1 }
  0xee   : > { %v467_v2 = vpop.f32.mrb[4].mxu0  ;;  %v583_v26 = vpop.f32.mrb[4].mxu1 }
  0xef   : > { %v2483_v37 = vpop.f32.mrb[5].mxu0  ;;  %v584_v20 = vadd.f32 %v583_v26, %v467_v2  ;;  %v2505_v32 = vpop.f32.mrb[5].mxu1 }
  0xf0   : > { %v470_v36 = vpop.f32.mrb[6].mxu0  ;;  %v586_v31 = vpop.f32.mrb[6].mxu1 }
  0xf1   : > { %v2484_v34 = vpop.f32.mrb[7].mxu0  ;;  %v587_v35 = vadd.f32 %v586_v31, %v470_v36  ;;  %v2506_v38 = vpop.f32.mrb[7].mxu1 }
  0xf6   : > { %v475_v40 = vpop.f32.mrb[8].mxu0  ;;  %v591_v41 = vpop.f32.mrb[8].mxu1 }
  0xf7   : > { %v2487_v42 = vpop.f32.mrb[9].mxu0  ;;  %v592_v43 = vadd.f32 %v591_v41, %v475_v40  ;;  %v2509_v22 = vpop.f32.mrb[9].mxu1 }
  0xf8   : > { %v478_v45 = vpop.f32.mrb[10].mxu0  ;;  %v594_v46 = vpop.f32.mrb[10].mxu1 }
  0xf9   : > { %v2488_v47 = vpop.f32.mrb[11].mxu0  ;;  %v595_v27 = vadd.f32 %v594_v46, %v478_v45  ;;  %v2510_v16 = vpop.f32.mrb[11].mxu1 }
  0xfe   : > { %v483_v29 = vpop.f32.mrb[12].mxu0  ;;  %v599_v28 = vpop.f32.mrb[12].mxu1 }
  0xff   : > { %v2491_v30 = vpop.f32.mrb[13].mxu0  ;;  %v600_v51 = vadd.f32 %v599_v28, %v483_v29  ;;  %v2513_v52 = vpop.f32.mrb[13].mxu1 }
 0x100   : > { %v486_v53 = vpop.f32.mrb[14].mxu0  ;;  %v602_v54 = vpop.f32.mrb[14].mxu1 }
 0x101   : > { %v2492_v56 = vpop.f32.mrb[15].mxu0  ;;  %v603_v57 = vadd.f32 %v602_v54, %v486_v53  ;;  %v2514_v58 = vpop.f32.mrb[15].mxu1 }
 0x106   : > { %v491_v60 = vpop.f32.mrb[16].mxu0  ;;  %v607_v61 = vpop.f32.mrb[16].mxu1 }
 0x107   : > { %v2495_v62 = vpop.f32.mrb[17].mxu0  ;;  %v608_v1 = vadd.f32 %v607_v61, %v491_v60  ;;  %v2517_v3 = vpop.f32.mrb[17].mxu1 }
 0x108   : > { %v494_v4 = vpop.f32.mrb[18].mxu0  ;;  %v610_v5 = vpop.f32.mrb[18].mxu1 }
 0x109   : > { %v2496_v6 = vpop.f32.mrb[19].mxu0  ;;  %v611_v7 = vadd.f32 %v610_v5, %v494_v4  ;;  %v2518_v8 = vpop.f32.mrb[19].mxu1 }
 0x10a   : > { %v3242_v6 = vld [vmem:[%s3357_s4] ss:$0 sm:$0xff] }
 0x10e   : > { %v752_v9 = vpop.f32.mrb[20].mxu0  ;;  %v891_v11 = vpop.f32.mrb[20].mxu1 }
 0x10f   : > { %v791_v0 = vadd.f32 %v752_v9, %v576_v13  ;;  %v2523_v12 = vpop.f32.mrb[21].mxu0  ;;  %v2545_v17 = vpop.f32.mrb[21].mxu1 }
 0x110   : > { %v755_v23 = vpop.f32.mrb[22].mxu0  ;;  %v894_v44 = vpop.f32.mrb[22].mxu1 }
 0x111   : > { %v930_v39 = vadd.f32 %v891_v11, %v791_v0  ;;  %v792_v33 = vadd.f32 %v755_v23, %v579_v24  ;;  %v2524_v48 = vpop.f32.mrb[23].mxu0  ;;  %v2546_v50 = vpop.f32.mrb[23].mxu1 }
 0x113   : > { %v931_v49 = vadd.f32 %v894_v44, %v792_v33 }
 0x116   : > { %v760_v63 = vpop.f32.mrb[24].mxu0  ;;  %v899_v15 = vpop.f32.mrb[24].mxu1 }
 0x117   : > { %v793_v55 = vadd.f32 %v760_v63, %v584_v20  ;;  %v2527_v59 = vpop.f32.mrb[25].mxu0  ;;  %v2549_v10 = vpop.f32.mrb[25].mxu1 }
 0x118   : > { %v763_v14 = vpop.f32.mrb[26].mxu0  ;;  %v902_v21 = vpop.f32.mrb[26].mxu1 }
 0x119   : > { %v932_v18 = vadd.f32 %v899_v15, %v793_v55  ;;  %v794_v19 = vadd.f32 %v763_v14, %v587_v35  ;;  %v2528_v13 = vpop.f32.mrb[27].mxu0  ;;  %v2550_v25 = vpop.f32.mrb[27].mxu1 }
 0x11b   : > { %v933_v2 = vadd.f32 %v902_v21, %v794_v19 }
 0x11e   : > { %v768_v26 = vpop.f32.mrb[28].mxu0  ;;  %v907_v32 = vpop.f32.mrb[28].mxu1 }
 0x11f   : > { %v795_v37 = vadd.f32 %v768_v26, %v592_v43  ;;  %v2531_v24 = vpop.f32.mrb[29].mxu0  ;;  %v2553_v36 = vpop.f32.mrb[29].mxu1 }
 0x120   : > { %v771_v31 = vpop.f32.mrb[30].mxu0  ;;  %v910_v40 = vpop.f32.mrb[30].mxu1 }
 0x121   : > { %v934_v34 = vadd.f32 %v907_v32, %v795_v37  ;;  %v796_v38 = vadd.f32 %v771_v31, %v595_v27  ;;  %v2532_v20 = vpop.f32.mrb[31].mxu0  ;;  %v2554_v41 = vpop.f32.mrb[31].mxu1 }
 0x123   : > { %v3229_v42 = vadd.f32 %v910_v40, %v796_v38 }
 0x126   : > { %v776_v22 = vpop.f32.mrb[32].mxu0  ;;  %v915_v35 = vpop.f32.mrb[32].mxu1 }
 0x127   : > { %v797_v45 = vadd.f32 %v776_v22, %v600_v51  ;;  %v2535_v46 = vpop.f32.mrb[33].mxu0  ;;  %v2557_v47 = vpop.f32.mrb[33].mxu1 }
 0x128   : > { %v779_v16 = vpop.f32.mrb[34].mxu0  ;;  %v918_v28 = vpop.f32.mrb[34].mxu1 }
 0x129   : > { %v3231_v29 = vadd.f32 %v915_v35, %v797_v45  ;;  %v798_v43 = vadd.f32 %v779_v16, %v603_v57  ;;  %v2536_v30 = vpop.f32.mrb[35].mxu0  ;;  %v2558_v52 = vpop.f32.mrb[35].mxu1 }
 0x12b   : > { %v3233_v53 = vadd.f32 %v918_v28, %v798_v43 }
 0x12e   : > { %v784_v27 = vpop.f32.mrb[36].mxu0  ;;  %v923_v56 = vpop.f32.mrb[36].mxu1 }
 0x12f   : > { %v799_v54 = vadd.f32 %v784_v27, %v608_v1  ;;  %v2539_v58 = vpop.f32.mrb[37].mxu0  ;;  %v2561_v60 = vpop.f32.mrb[37].mxu1 }
 0x130   : > { %v787_v61 = vpop.f32.mrb[38].mxu0  ;;  %v926_v3 = vpop.f32.mrb[38].mxu1 }
 0x131   : > { %v3235_v51 = vadd.f32 %v923_v56, %v799_v54  ;;  %v800_v62 = vadd.f32 %v787_v61, %v611_v7  ;;  %v2540_v4 = vpop.f32.mrb[39].mxu0  ;;  %v2562_v5 = vpop.f32.mrb[39].mxu1 }
 0x133   : > { %v3237_v57 = vadd.f32 %v926_v3, %v800_v62 }
 0x136   : > { %v1030_v1 = vpop.f32.mrb[40].mxu0  ;;  %v1124_v9 = vpop.f32.mrb[40].mxu1 }
 0x137   : > { %v3244_v8 = vadd.f32 %v1030_v1, %v930_v39  ;;  %v2567_v0 = vpop.f32.mrb[41].mxu0  ;;  %v1125_v11 = vadd.f32 %v3242_v6, %v1124_v9  ;;  %v2589_v7 = vpop.f32.mrb[41].mxu1 }
 0x138   : > { %v1033_v12 = vpop.f32.mrb[42].mxu0  ;;  %v1127_v23 = vpop.f32.mrb[42].mxu1 }
 0x139   : > { %v3248_v17 = vadd.f32 %v1033_v12, %v931_v49  ;;  %v2568_v33 = vpop.f32.mrb[43].mxu0  ;;  %v1128_v44 = vadd.f32 %v3242_v6, %v1127_v23  ;;  %v2590_v48 = vpop.f32.mrb[43].mxu1 }
 0x13b   : > { %v2360_v39 = vpack.c.bf16 %v1128_v44, %v1125_v11 }
 0x13d   : > { %2361 = vst [vmem:[%s3256_s10] sm:$0xff] %v2360_v39  }
 0x13e   : > { %v1038_v50 = vpop.f32.mrb[44].mxu0  ;;  %v1132_v49 = vpop.f32.mrb[44].mxu1 }
 0x13f   : > { %v3259_v63 = vadd.f32 %v1038_v50, %v932_v18  ;;  %v2571_v55 = vpop.f32.mrb[45].mxu0  ;;  %v1133_v15 = vadd.f32 %v3242_v6, %v1132_v49  ;;  %v2593_v59 = vpop.f32.mrb[45].mxu1 }
 0x140   : > { %v1041_v10 = vpop.f32.mrb[46].mxu0  ;;  %v1135_v19 = vpop.f32.mrb[46].mxu1 }
 0x141   : > { %v3262_v14 = vadd.f32 %v1041_v10, %v933_v2  ;;  %v2572_v21 = vpop.f32.mrb[47].mxu0  ;;  %v1136_v13 = vadd.f32 %v3242_v6, %v1135_v19  ;;  %v2594_v25 = vpop.f32.mrb[47].mxu1 }
 0x143   : > { %v2365_v26 = vpack.c.bf16 %v1136_v13, %v1133_v15 }
 0x145   : > { %2407 = vst [vmem:[%s3256_s10 + $0x8] sm:$0xff] %v2365_v26  }
 0x146   : > { %v1046_v37 = vpop.f32.mrb[48].mxu0  ;;  %v1140_v18 = vpop.f32.mrb[48].mxu1 }
 0x147   : > { %v3266_v32 = vadd.f32 %v1046_v37, %v934_v34  ;;  %v2575_v24 = vpop.f32.mrb[49].mxu0  ;;  %v1141_v36 = vadd.f32 %v3242_v6, %v1140_v18  ;;  %v2597_v31 = vpop.f32.mrb[49].mxu1 }
 0x148   : > { %v1049_v38 = vpop.f32.mrb[50].mxu0  ;;  %v1143_v40 = vpop.f32.mrb[50].mxu1 }
 0x149   : > { %v3270_v2 = vadd.f32 %v1049_v38, %v3229_v42  ;;  %v2576_v20 = vpop.f32.mrb[51].mxu0  ;;  %v1144_v41 = vadd.f32 %v3242_v6, %v1143_v40  ;;  %v2598_v22 = vpop.f32.mrb[51].mxu1 }
 0x14b   : > { %v2370_v45 = vpack.c.bf16 %v1144_v41, %v1141_v36 }
 0x14d   : > { %2408 = vst [vmem:[%s3256_s10 + $0x10] sm:$0xff] %v2370_v45  }
 0x14e   : > { %v1054_v35 = vpop.f32.mrb[52].mxu0  ;;  %v1148_v46 = vpop.f32.mrb[52].mxu1 }
 0x14f   : > { %v3275_v34 = vadd.f32 %v1054_v35, %v3231_v29  ;;  %v2579_v47 = vpop.f32.mrb[53].mxu0  ;;  %v1149_v16 = vadd.f32 %v3242_v6, %v1148_v46  ;;  %v2601_v43 = vpop.f32.mrb[53].mxu1 }
 0x150   : > { %v1057_v28 = vpop.f32.mrb[54].mxu0  ;;  %v1151_v30 = vpop.f32.mrb[54].mxu1 }
 0x151   : > { %v3279_v42 = vadd.f32 %v1057_v28, %v3233_v53  ;;  %v2580_v52 = vpop.f32.mrb[55].mxu0  ;;  %v1152_v27 = vadd.f32 %v3242_v6, %v1151_v30  ;;  %v2602_v54 = vpop.f32.mrb[55].mxu1 }
 0x153   : > { %v2375_v56 = vpack.c.bf16 %v1152_v27, %v1149_v16 }
 0x155   : > { %2409 = vst [vmem:[%s3256_s10 + $0x18] sm:$0xff] %v2375_v56  }
 0x156   : > { %v1062_v58 = vpop.f32.mrb[56].mxu0  ;;  %v1156_v60 = vpop.f32.mrb[56].mxu1 }
 0x157   : > { %v1077_v29 = vadd.f32 %v1062_v58, %v3235_v51  ;;  %v2583_v61 = vpop.f32.mrb[57].mxu0  ;;  %v1157_v62 = vadd.f32 %v3242_v6, %v1156_v60  ;;  %v2605_v3 = vpop.f32.mrb[57].mxu1 }
 0x158   : > { %v1065_v4 = vpop.f32.mrb[58].mxu0  ;;  %v1159_v5 = vpop.f32.mrb[58].mxu1 }
 0x159   : > { %v1078_v53 = vadd.f32 %v1065_v4, %v3237_v57  ;;  %v2584_v1 = vpop.f32.mrb[59].mxu0  ;;  %v1160_v9 = vadd.f32 %v3242_v6, %v1159_v5  ;;  %v2606_v0 = vpop.f32.mrb[59].mxu1 }
 0x15b   : > { %v2380_v11 = vpack.c.bf16 %v1160_v9, %v1157_v62 }
 0x15d   : > { %2410 = vst [vmem:[%s3256_s10 + $0x20] sm:$0xff] %v2380_v11  }
 0x15e   : > { %v1350_v7 = vpop.f32.mrb[60].mxu0  ;;  %v1536_v23 = vpop.f32.mrb[60].mxu1 }
 0x15f   : > { %v1389_v12 = vadd.f32 %v1350_v7, %v3244_v8  ;;  %v2611_v51 = vpop.f32.mrb[61].mxu0  ;;  %v2633_v33 = vpop.f32.mrb[61].mxu1 }
 0x160   : > { %v1353_v44 = vpop.f32.mrb[62].mxu0  ;;  %v1539_v50 = vpop.f32.mrb[62].mxu1 }
 0x161   : > { %v1575_v48 = vadd.f32 %v1536_v23, %v1389_v12  ;;  %v1390_v39 = vadd.f32 %v1353_v44, %v3248_v17  ;;  %v2612_v49 = vpop.f32.mrb[63].mxu0  ;;  %v2634_v57 = vpop.f32.mrb[63].mxu1 }
 0x163   : > { %v1576_v55 = vadd.f32 %v1539_v50, %v1390_v39 }
 0x166   : > { %v1358_v15 = vpop.f32.mrb[64].mxu0  ;;  %v1544_v59 = vpop.f32.mrb[64].mxu1 }
 0x167   : > { %v1391_v6 = vadd.f32 %v1358_v15, %v3259_v63  ;;  %v2615_v10 = vpop.f32.mrb[65].mxu0  ;;  %v2637_v19 = vpop.f32.mrb[65].mxu1 }
 0x168   : > { %v1361_v21 = vpop.f32.mrb[66].mxu0  ;;  %v1547_v25 = vpop.f32.mrb[66].mxu1 }
 0x169   : > { %v1577_v13 = vadd.f32 %v1544_v59, %v1391_v6  ;;  %v1392_v8 = vadd.f32 %v1361_v21, %v3262_v14  ;;  %v2616_v26 = vpop.f32.mrb[67].mxu0  ;;  %v2638_v37 = vpop.f32.mrb[67].mxu1 }
 0x16b   : > { %v3292_v18 = vadd.f32 %v1547_v25, %v1392_v8 }
 0x16e   : > { %v1366_v17 = vpop.f32.mrb[68].mxu0  ;;  %v1552_v36 = vpop.f32.mrb[68].mxu1 }
 0x16f   : > { %v1393_v24 = vadd.f32 %v1366_v17, %v3266_v32  ;;  %v2619_v31 = vpop.f32.mrb[69].mxu0  ;;  %v2641_v38 = vpop.f32.mrb[69].mxu1 }
 0x170   : > { %v1369_v40 = vpop.f32.mrb[70].mxu0  ;;  %v1555_v41 = vpop.f32.mrb[70].mxu1 }
 0x171   : > { %v3295_v63 = vadd.f32 %v1552_v36, %v1393_v24  ;;  %v1394_v20 = vadd.f32 %v1369_v40, %v3270_v2  ;;  %v2620_v22 = vpop.f32.mrb[71].mxu0  ;;  %v2642_v45 = vpop.f32.mrb[71].mxu1 }
 0x173   : > { %v3298_v14 = vadd.f32 %v1555_v41, %v1394_v20 }
 0x176   : > { %v1374_v35 = vpop.f32.mrb[72].mxu0  ;;  %v1560_v47 = vpop.f32.mrb[72].mxu1 }
 0x177   : > { %v1395_v46 = vadd.f32 %v1374_v35, %v3275_v34  ;;  %v2623_v16 = vpop.f32.mrb[73].mxu0  ;;  %v2645_v43 = vpop.f32.mrb[73].mxu1 }
 0x178   : > { %v1377_v32 = vpop.f32.mrb[74].mxu0  ;;  %v1563_v52 = vpop.f32.mrb[74].mxu1 }
 0x179   : > { %v3301_v28 = vadd.f32 %v1560_v47, %v1395_v46  ;;  %v1396_v30 = vadd.f32 %v1377_v32, %v3279_v42  ;;  %v2624_v27 = vpop.f32.mrb[75].mxu0  ;;  %v2646_v54 = vpop.f32.mrb[75].mxu1 }
 0x17b   : > { %v3304_v2 = vadd.f32 %v1563_v52, %v1396_v30 }
 0x17e   : > { %v1382_v56 = vpop.f32.mrb[76].mxu0  ;;  %v1568_v60 = vpop.f32.mrb[76].mxu1 }
 0x17f   : > { %v1397_v58 = vadd.f32 %v1382_v56, %v1077_v29  ;;  %v2627_v61 = vpop.f32.mrb[77].mxu0  ;;  %v2649_v62 = vpop.f32.mrb[77].mxu1  ;;  %v3313_v29 = vld [vmem:[%s3355_s2] ss:$0 sm:$0xff] }
 0x180   : > { %v1385_v3 = vpop.f32.mrb[78].mxu0  ;;  %v1571_v5 = vpop.f32.mrb[78].mxu1 }
 0x181   : > { %v3306_v34 = vadd.f32 %v1568_v60, %v1397_v58  ;;  %v1398_v4 = vadd.f32 %v1385_v3, %v1078_v53  ;;  %v2628_v1 = vpop.f32.mrb[79].mxu0  ;;  %v2650_v9 = vpop.f32.mrb[79].mxu1 }
 0x183   : > { %v3308_v0 = vadd.f32 %v1571_v5, %v1398_v4 }
 0x186   : > { %v1722_v42 = vpop.f32.mrb[80].mxu0  ;;  %v1841_v7 = vpop.f32.mrb[80].mxu1 }
 0x187   : > { %v1761_v11 = vadd.f32 %v1722_v42, %v1575_v48  ;;  %v2655_v12 = vpop.f32.mrb[81].mxu0  ;;  %v2677_v23 = vpop.f32.mrb[81].mxu1 }
 0x188   : > { %v1725_v51 = vpop.f32.mrb[82].mxu0  ;;  %v1844_v53 = vpop.f32.mrb[82].mxu1 }
 0x189   : > { %v1880_v33 = vadd.f32 %v1841_v7, %v1761_v11  ;;  %v1762_v44 = vadd.f32 %v1725_v51, %v1576_v55  ;;  %v2656_v39 = vpop.f32.mrb[83].mxu0  ;;  %v2678_v50 = vpop.f32.mrb[83].mxu1 }
 0x18b   : > { %v1897_v49 = vadd.f32 %v3313_v29, %v1880_v33  ;;  %v1881_v57 = vadd.f32 %v1844_v53, %v1762_v44 }
 0x18d   : > { %v1898_v48 = vadd.f32 %v3313_v29, %v1881_v57  ;;  %v1907_v6 = vmax.f32 %v1897_v49, 0.0 }
 0x18e   : > { %v1730_v15 = vpop.f32.mrb[84].mxu0  ;;  %v1849_v19 = vpop.f32.mrb[84].mxu1 }
 0x18f   : > { %v1908_v59 = vmax.f32 %v1898_v48, 0.0  ;;  %v1763_v10 = vadd.f32 %v1730_v15, %v1577_v13  ;;  %v2659_v21 = vpop.f32.mrb[85].mxu0  ;;  %v2681_v55 = vpop.f32.mrb[85].mxu1 }
 0x190   : > { %v1733_v8 = vpop.f32.mrb[86].mxu0  ;;  %v1852_v17 = vpop.f32.mrb[86].mxu1 }
 0x191   : > { %v2385_v25 = vpack.c.bf16 %v1908_v59, %v1907_v6  ;;  %v1882_v26 = vadd.f32 %v1849_v19, %v1763_v10  ;;  %v1764_v37 = vadd.f32 %v1733_v8, %v3292_v18  ;;  %v2660_v24 = vpop.f32.mrb[87].mxu0  ;;  %v2682_v36 = vpop.f32.mrb[87].mxu1 }
 0x193   : > { %2386 = vst [vmem:[%s3322_s15] sm:$0xff] %v2385_v25   ;;  %v1899_v13 = vadd.f32 %v3313_v29, %v1882_v26  ;;  %v1883_v31 = vadd.f32 %v1852_v17, %v1764_v37 }
 0x195   : > { %v1900_v38 = vadd.f32 %v3313_v29, %v1883_v31  ;;  %v1909_v20 = vmax.f32 %v1899_v13, 0.0 }
 0x196   : > { %v1738_v40 = vpop.f32.mrb[88].mxu0  ;;  %v1857_v45 = vpop.f32.mrb[88].mxu1 }
 0x197   : > { %v1910_v41 = vmax.f32 %v1900_v38, 0.0  ;;  %v1765_v22 = vadd.f32 %v1738_v40, %v3295_v63  ;;  %v2663_v35 = vpop.f32.mrb[89].mxu0  ;;  %v2685_v46 = vpop.f32.mrb[89].mxu1 }
 0x198   : > { %v1741_v47 = vpop.f32.mrb[90].mxu0  ;;  %v1860_v32 = vpop.f32.mrb[90].mxu1 }
 0x199   : > { %v2390_v18 = vpack.c.bf16 %v1910_v41, %v1909_v20  ;;  %v1884_v16 = vadd.f32 %v1857_v45, %v1765_v22  ;;  %v1766_v43 = vadd.f32 %v1741_v47, %v3298_v14  ;;  %v2664_v30 = vpop.f32.mrb[91].mxu0  ;;  %v2686_v52 = vpop.f32.mrb[91].mxu1 }
 0x19b   : > { %2411 = vst [vmem:[%s3322_s15 + $0x8] sm:$0xff] %v2390_v18   ;;  %v1901_v27 = vadd.f32 %v3313_v29, %v1884_v16  ;;  %v1885_v54 = vadd.f32 %v1860_v32, %v1766_v43 }
 0x19d   : > { %v1902_v56 = vadd.f32 %v3313_v29, %v1885_v54  ;;  %v1911_v63 = vmax.f32 %v1901_v27, 0.0 }
 0x19e   : > { %v1746_v58 = vpop.f32.mrb[92].mxu0  ;;  %v1865_v62 = vpop.f32.mrb[92].mxu1 }
 0x19f   : > { %v1912_v60 = vmax.f32 %v1902_v56, 0.0  ;;  %v1767_v61 = vadd.f32 %v1746_v58, %v3301_v28  ;;  %v2667_v3 = vpop.f32.mrb[93].mxu0  ;;  %v2689_v4 = vpop.f32.mrb[93].mxu1 }
 0x1a0   : > { %v1749_v5 = vpop.f32.mrb[94].mxu0  ;;  %v1868_v42 = vpop.f32.mrb[94].mxu1 }
 0x1a1   : > { %v2395_v14 = vpack.c.bf16 %v1912_v60, %v1911_v63  ;;  %v1886_v1 = vadd.f32 %v1865_v62, %v1767_v61  ;;  %v1768_v9 = vadd.f32 %v1749_v5, %v3304_v2  ;;  %v2668_v11 = vpop.f32.mrb[95].mxu0  ;;  %v2690_v7 = vpop.f32.mrb[95].mxu1 }
 0x1a3   : > { %2412 = vst [vmem:[%s3322_s15 + $0x10] sm:$0xff] %v2395_v14   ;;  %v1903_v12 = vadd.f32 %v3313_v29, %v1886_v1  ;;  %v1887_v23 = vadd.f32 %v1868_v42, %v1768_v9 }
 0x1a5   : > { %v1904_v51 = vadd.f32 %v3313_v29, %v1887_v23  ;;  %v1913_v28 = vmax.f32 %v1903_v12, 0.0 }
 0x1a6   : > { %v1754_v33 = vpop.f32.mrb[96].mxu0  ;;  %v1873_v39 = vpop.f32.mrb[96].mxu1 }
 0x1a7   : > { %v1914_v44 = vmax.f32 %v1904_v51, 0.0  ;;  %v1769_v53 = vadd.f32 %v1754_v33, %v3306_v34  ;;  %v2671_v50 = vpop.f32.mrb[97].mxu0  ;;  %v2693_v49 = vpop.f32.mrb[97].mxu1 }
 0x1a8   : > { %v1757_v2 = vpop.f32.mrb[98].mxu0  ;;  %v1876_v6 = vpop.f32.mrb[98].mxu1 }
 0x1a9   : > { %v2400_v57 = vpack.c.bf16 %v1914_v44, %v1913_v28  ;;  %v1888_v48 = vadd.f32 %v1873_v39, %v1769_v53  ;;  %v1770_v15 = vadd.f32 %v1757_v2, %v3308_v0  ;;  %v2672_v59 = vpop.f32.mrb[99].mxu0  ;;  %v2694_v10 = vpop.f32.mrb[99].mxu1 }
 0x1ab   : > { %2413 = vst [vmem:[%s3322_s15 + $0x18] sm:$0xff] %v2400_v57   ;;  %v1905_v19 = vadd.f32 %v3313_v29, %v1888_v48  ;;  %v1889_v21 = vadd.f32 %v1876_v6, %v1770_v15 }
 0x1ad   : > { %v1906_v55 = vadd.f32 %v3313_v29, %v1889_v21  ;;  %v1915_v8 = vmax.f32 %v1905_v19, 0.0 }
 0x1af   : > { %v1916_v34 = vmax.f32 %v1906_v55, 0.0 }
 0x1b1   : > { %v2405_v25 = vpack.c.bf16 %v1916_v34, %v1915_v8 }
 0x1b3   : > { %2414 = vst [vmem:[%s3322_s15 + $0x20] sm:$0xff] %v2405_v25  }
 0x1b4 PF: > { %s17_s23 = sadd.s32 1, %s2790_s23   ;;  %s3360_s21 = smov %s2786_s22 }
 0x1b5   : > { %p14_p5 = scmp.ge.s32.totalorder %s17_s23, 4   ;;  %s3361_s22 = smov %s3363_s24 }
 0x1b7   :  { %16 = sbr.rel (!%p14_p5) target bundleno = 2 (0x2), region = 105 }

</bundles_post_ra>
